<compile_context>
chip_gen: v6e
topology: v6e:2x2x1
jax: 0.10.0
libtpu: 0.0.40
codegen_flags: <defaults>
</compile_context>

<pallas_src>
import functools

import jax
import jax.numpy as jnp
from jax import lax
from jax.experimental import pallas as pl
from jax.experimental.pallas import tpu as pltpu


# --------------------------------------------------------------------------
# Helpers
# --------------------------------------------------------------------------
def _round_up(x, m):
    return ((x + m - 1) // m) * m


def _pad_gate_cols(w, h, hp):
    """(rows, 4H) -> (rows, 4Hp) with gate k's columns at [k*Hp, k*Hp + H)."""
    rows = w.shape[0]
    w4 = w.reshape(rows, 4, h)
    w4 = jnp.pad(w4, ((0, 0), (0, 0), (0, hp - h)))
    return w4.reshape(rows, 4 * hp)


# --------------------------------------------------------------------------
# Kernel
# --------------------------------------------------------------------------
def _fplstm_kernel(x_ref, wih_ref, whh_ref, bias_ref,
                   w1_ref, b1_ref, w2_ref, b2_ref,
                   out_ref, xp_sc, h_sc, c_sc,
                   *, chunk, bblk, hp, seq_len, mask_tail):
    """One grid step = `chunk` LSTM timesteps for one batch block.

    x_ref   : (chunk*bblk, D)   raw inputs, rows ordered (t, b)
    wih_ref : (D, 4Hp)          W_ih^T, per-gate zero-padded to Hp lanes
    whh_ref : (Hp, 4Hp)         W_hh^T, zero-padded rows/cols
    bias_ref: (1, 4Hp)          b_ih + b_hh, per-gate zero-padded
    w1/b1/w2/b2                 FC head (fc1 rows zero-padded to Hp)
    out_ref : (bblk, C)         logits (written only on the last chunk)
    xp_sc   : (chunk*bblk, 4Hp) VMEM scratch for the chunk's input projection
    h_sc/c_sc: (bblk, Hp)       recurrent state carried across chunks
    """
    c_idx = pl.program_id(1)

    @pl.when(c_idx == 0)
    def _():
        h_sc[...] = jnp.zeros_like(h_sc)
        c_sc[...] = jnp.zeros_like(c_sc)

    # Fused input projection for the whole chunk as ONE MXU-friendly GEMM
    # (the MXU is nearly idle during the serial recurrence, so this is ~free).
    xp_sc[...] = (
        jnp.dot(x_ref[...], wih_ref[...], preferred_element_type=jnp.float32)
        + bias_ref[...])

    chunk_start = c_idx * chunk

    def step(s, carry):
        h, c = carry
        row = pl.multiple_of(s * bblk, bblk)
        gates = xp_sc[pl.ds(row, bblk), :] + jnp.dot(
            h, whh_ref[...], preferred_element_type=jnp.float32)
        # PyTorch gate order: input, forget, cell(g), output.  Each slice is a
        # lane-aligned (Hp % 128 == 0) whole-vreg slab.
        i_g = jax.nn.sigmoid(gates[:, 0 * hp:1 * hp])
        f_g = jax.nn.sigmoid(gates[:, 1 * hp:2 * hp])
        g_g = jnp.tanh(gates[:, 2 * hp:3 * hp])
        o_g = jax.nn.sigmoid(gates[:, 3 * hp:4 * hp])
        c_new = f_g * c + i_g * g_g
        h_new = o_g * jnp.tanh(c_new)
        if mask_tail:  # only traced when T was padded up to a chunk multiple
            valid = (chunk_start + s) < seq_len
            h_new = jnp.where(valid, h_new, h)
            c_new = jnp.where(valid, c_new, c)
        return h_new, c_new

    h, c = lax.fori_loop(0, chunk, step, (h_sc[...], c_sc[...]),
                         unroll=min(chunk, 8))
    h_sc[...] = h
    c_sc[...] = c

    # FC head fused into the final chunk: no second launch, no h_last HBM trip.
    @pl.when(c_idx == pl.num_programs(1) - 1)
    def _():
        fc1 = jnp.dot(h, w1_ref[...],
                      preferred_element_type=jnp.float32) + b1_ref[...]
        fc1 = jnp.maximum(fc1, 0.0)
        out_ref[...] = (jnp.dot(fc1, w2_ref[...],
                                preferred_element_type=jnp.float32)
                        + b2_ref[...]).astype(out_ref.dtype)


# --------------------------------------------------------------------------
# Wrapper
# --------------------------------------------------------------------------
def fplstm_forward(x, params, *, time_chunk=None, batch_blocks=None):
    """x: (T, B, D) float32.  Returns (B, n_classes) logits."""
    T, B, D = x.shape
    w_ih, w_hh, b_ih, b_hh, w1, b1, w2, b2 = params
    H = w_hh.shape[1]            # w_hh is (4H, H)
    F1 = w1.shape[0]
    C = w2.shape[0]

    Hp = _round_up(H, 128)                       # lane-align every gate slab
    B_pad = _round_up(max(B, 8), 8)              # fill vreg sublanes

    # Batch blocking (>1 only pays off with >1 TensorCore per chip, i.e. v7x).
    if batch_blocks is None:
        batch_blocks = 1
    assert B_pad % batch_blocks == 0 and (B_pad // batch_blocks) % 8 == 0
    Bblk = B_pad // batch_blocks

    # ---- VMEM budget & time-chunk sizing ---------------------------------
    try:
        vmem_cap = int(pltpu.get_tpu_info().vmem_capacity_bytes)
    except Exception:
        vmem_cap = 64 << 20                      # v7x physical floor
    vmem_budget = (vmem_cap * 3) // 4            # leave headroom

    f32 = 4
    fixed = f32 * (2 * D * 4 * Hp + 2 * Hp * 4 * Hp + 2 * 4 * Hp   # LSTM wts
                   + 2 * Hp * F1 + 2 * F1 + 2 * F1 * C + 2 * C     # FC wts
                   + 2 * Bblk * C                                  # out buf
                   + 2 * Bblk * Hp)                                # h/c state
    per_tc = f32 * (2 * Bblk * D + Bblk * 4 * Hp)  # x (dbl-buf) + xp scratch
    if time_chunk is None:
        time_chunk = max(1, min(T, (vmem_budget - fixed) // per_tc, 128))
    TC = int(time_chunk)
    T_pad = _round_up(T, TC)
    n_chunks = T_pad // TC
    mask_tail = (T_pad != T)

    # ---- parameter prep (zero-padded to lane-aligned shapes) --------------
    wih_t = _pad_gate_cols(jnp.transpose(w_ih).astype(jnp.float32), H, Hp)
    whh_t = jnp.transpose(w_hh).astype(jnp.float32)                 # (H, 4H)
    whh_t = jnp.pad(whh_t, ((0, Hp - H), (0, 0)))                   # (Hp, 4H)
    whh_t = _pad_gate_cols(whh_t, H, Hp)                            # (Hp, 4Hp)
    bias = _pad_gate_cols((b_ih + b_hh).reshape(1, 4 * H).astype(jnp.float32),
                          H, Hp)                                    # (1, 4Hp)
    w1_t = jnp.pad(jnp.transpose(w1).astype(jnp.float32),
                   ((0, Hp - H), (0, 0)))                           # (Hp, F1)
    w2_t = jnp.transpose(w2).astype(jnp.float32)                    # (F1, C)
    b1r = b1.reshape(1, F1).astype(jnp.float32)
    b2r = b2.reshape(1, C).astype(jnp.float32)

    # ---- input rearrangement: (T,B,D) -> (batch_blocks, T_pad*Bblk, D) ----
    # Rows within a chunk are ordered (t, b) so the kernel sees a ready-made
    # 2-D GEMM operand and never reshapes in-kernel.
    xf = jnp.pad(x.astype(jnp.float32),
                 ((0, T_pad - T), (0, B_pad - B), (0, 0)))
    xr = (xf.transpose(1, 0, 2)                       # (B_pad, T_pad, D)
          .reshape(batch_blocks, Bblk, T_pad, D)
          .transpose(0, 2, 1, 3)                      # (bb, T_pad, Bblk, D)
          .reshape(batch_blocks, T_pad * Bblk, D))

    kernel = functools.partial(_fplstm_kernel, chunk=TC, bblk=Bblk, hp=Hp,
                               seq_len=T, mask_tail=mask_tail)
    const2 = lambda b, c: (0, 0)

    logits = pl.pallas_call(
        kernel,
        out_shape=jax.ShapeDtypeStruct((B_pad, C), jnp.float32),
        grid_spec=pltpu.PrefetchScalarGridSpec(
            num_scalar_prefetch=0,
            grid=(batch_blocks, n_chunks),
            in_specs=[
                pl.BlockSpec((None, TC * Bblk, D), lambda b, c: (b, c, 0)),
                pl.BlockSpec((D, 4 * Hp), const2),
                pl.BlockSpec((Hp, 4 * Hp), const2),
                pl.BlockSpec((1, 4 * Hp), const2),
                pl.BlockSpec((Hp, F1), const2),
                pl.BlockSpec((1, F1), const2),
                pl.BlockSpec((F1, C), const2),
                pl.BlockSpec((1, C), const2),
            ],
            out_specs=pl.BlockSpec((Bblk, C), lambda b, c: (b, 0)),
            scratch_shapes=[
                pltpu.VMEM((TC * Bblk, 4 * Hp), jnp.float32),   # xp chunk
                pltpu.VMEM((Bblk, Hp), jnp.float32),            # h state
                pltpu.VMEM((Bblk, Hp), jnp.float32),            # c state
            ],
        ),
        compiler_params=pltpu.CompilerParams(
            dimension_semantics=("parallel", "arbitrary"),
            vmem_limit_bytes=int(vmem_budget)),
    )(xr, wih_t, whh_t, bias, w1_t, b1r, w2_t, b2r)

    # TODO(synk): nn.Dropout (do1/do2) is identity at inference and is omitted.
    return logits[:B]


# --------------------------------------------------------------------------
# Params / reference
# --------------------------------------------------------------------------
def init_params(key, input_size, lstm_size, fc1_size, n_classes):
    """Deterministic init mimicking PyTorch's uniform(-1/sqrt(H), 1/sqrt(H))."""
    ks = jax.random.split(key, 8)
    H, D, F1, C = lstm_size, input_size, fc1_size, n_classes
    s_lstm = 1.0 / jnp.sqrt(H)
    s_fc1 = 1.0 / jnp.sqrt(H)
    s_fc2 = 1.0 / jnp.sqrt(F1)
    u = lambda k, shape, s: jax.random.uniform(k, shape, jnp.float32, -s, s)
    w_ih = u(ks[0], (4 * H, D), s_lstm)
    w_hh = u(ks[1], (4 * H, H), s_lstm)
    b_ih = u(ks[2], (4 * H,), s_lstm)
    b_hh = u(ks[3], (4 * H,), s_lstm)
    w1 = u(ks[4], (F1, H), s_fc1)
    b1 = u(ks[5], (F1,), s_fc1)
    w2 = u(ks[6], (C, F1), s_fc2)
    b2 = u(ks[7], (F1 and C,), s_fc2) if False else u(ks[7], (C,), s_fc2)
    return (w_ih, w_hh, b_ih, b_hh, w1, b1, w2, b2)


def fplstm_reference(x, params):
    """Pure-JAX reference of the same forward pass."""
    w_ih, w_hh, b_ih, b_hh, w1, b1, w2, b2 = params
    H = w_hh.shape[1]
    T, B, _ = x.shape
    h = jnp.zeros((B, H), jnp.float32)
    c = jnp.zeros((B, H), jnp.float32)
    for t in range(T):
        gates = x[t] @ w_ih.T + b_ih + h @ w_hh.T + b_hh
        i_g = jax.nn.sigmoid(gates[:, 0 * H:1 * H])
        f_g = jax.nn.sigmoid(gates[:, 1 * H:2 * H])
        g_g = jnp.tanh(gates[:, 2 * H:3 * H])
        o_g = jax.nn.sigmoid(gates[:, 3 * H:4 * H])
        c = f_g * c + i_g * g_g
        h = o_g * jnp.tanh(c)
    fc1 = jnp.maximum(h @ w1.T + b1, 0.0)
    return fc1 @ w2.T + b2


# --------------------------------------------------------------------------
# Test
# --------------------------------------------------------------------------
if __name__ == "__main__":
    seq_len, batch = 8, 2
    input_size, lstm_size, fc1_size, n_classes = 16, 32, 64, 2

    key = jax.random.PRNGKey(0)
    kx, kp = jax.random.split(key)
    x = jax.random.normal(kx, (seq_len, batch, input_size), jnp.float32)
    params = init_params(kp, input_size, lstm_size, fc1_size, n_classes)

    out = fplstm_forward(x, params)
    out = jax.block_until_ready(out)

    ref = fplstm_reference(x, params)
    assert out.shape == (batch, n_classes), out.shape
    assert jnp.allclose(out, ref, rtol=2e-4, atol=2e-4), (out, ref)

    print("KERNEL_OK")
</pallas_src>

<mosaic_0001>
module attributes {stable_mosaic.version = 11 : i64} {
  func.func @_fplstm_kernel(%arg0: i32, %arg1: i32, %arg2: memref<1x64x16xf32, #tpu.memory_space<vmem>>, %arg3: memref<16x512xf32, #tpu.memory_space<vmem>>, %arg4: memref<128x512xf32, #tpu.memory_space<vmem>>, %arg5: memref<1x512xf32, #tpu.memory_space<vmem>>, %arg6: memref<128x64xf32, #tpu.memory_space<vmem>>, %arg7: memref<1x64xf32, #tpu.memory_space<vmem>>, %arg8: memref<64x2xf32, #tpu.memory_space<vmem>>, %arg9: memref<1x2xf32, #tpu.memory_space<vmem>>, %arg10: memref<8x2xf32, #tpu.memory_space<vmem>>, %arg11: memref<64x512xf32, #tpu.memory_space<vmem>>, %arg12: memref<8x128xf32, #tpu.memory_space<vmem>>, %arg13: memref<8x128xf32, #tpu.memory_space<vmem>>) attributes {dimension_semantics = [#tpu.dimension_semantics<parallel>, #tpu.dimension_semantics<arbitrary>], iteration_bounds = array<i64: 1, 1>, scalar_prefetch = 0 : i64, scratch_operands = 3 : i64, tpu.core_type = #tpu.core_type<tc>, window_params = [{transform_indices = @transform_0, window_bounds = array<i64: 1, 64, 16>}, {pipeline_mode = #tpu.pipeline_mode<synchronous>, transform_indices = @transform_1, window_bounds = array<i64: 16, 512>}, {pipeline_mode = #tpu.pipeline_mode<synchronous>, transform_indices = @transform_2, window_bounds = array<i64: 128, 512>}, {pipeline_mode = #tpu.pipeline_mode<synchronous>, transform_indices = @transform_3, window_bounds = array<i64: 1, 512>}, {pipeline_mode = #tpu.pipeline_mode<synchronous>, transform_indices = @transform_4, window_bounds = array<i64: 128, 64>}, {pipeline_mode = #tpu.pipeline_mode<synchronous>, transform_indices = @transform_5, window_bounds = array<i64: 1, 64>}, {pipeline_mode = #tpu.pipeline_mode<synchronous>, transform_indices = @transform_6, window_bounds = array<i64: 64, 2>}, {pipeline_mode = #tpu.pipeline_mode<synchronous>, transform_indices = @transform_7, window_bounds = array<i64: 1, 2>}, {transform_indices = @transform_8, window_bounds = array<i64: 8, 2>}]} {
    %c0_i32 = arith.constant 0 : i32
    %0 = arith.cmpi eq, %arg1, %c0_i32 : i32
    %1 = arith.extui %0 : i1 to i32
    %c0_i32_0 = arith.constant 0 : i32
    %2 = arith.cmpi ne, %1, %c0_i32_0 : i32
    scf.if %2 {
      %cst_84 = arith.constant 0.000000e+00 : f32
      %274 = vector.broadcast %cst_84 : f32 to vector<8x128xf32>
      %c0_85 = arith.constant 0 : index
      %c0_86 = arith.constant 0 : index
      %275 = vector.load %arg12[%c0_85, %c0_86] : memref<8x128xf32, #tpu.memory_space<vmem>>, vector<8x128xf32>
      tpu.vector_store %arg12[%c0_85, %c0_86], %274 {strides = array<i32>} : memref<8x128xf32, #tpu.memory_space<vmem>>, vector<8x128xf32>,
      %cst_87 = arith.constant 0.000000e+00 : f32
      %276 = vector.broadcast %cst_87 : f32 to vector<8x128xf32>
      %c0_88 = arith.constant 0 : index
      %c0_89 = arith.constant 0 : index
      %277 = vector.load %arg13[%c0_88, %c0_89] : memref<8x128xf32, #tpu.memory_space<vmem>>, vector<8x128xf32>
      tpu.vector_store %arg13[%c0_88, %c0_89], %276 {strides = array<i32>} : memref<8x128xf32, #tpu.memory_space<vmem>>, vector<8x128xf32>,
    } else {
    }
    %c0 = arith.constant 0 : index
    %c0_1 = arith.constant 0 : index
    %c0_2 = arith.constant 0 : index
    %3 = vector.load %arg2[%c0, %c0_1, %c0_2] : memref<1x64x16xf32, #tpu.memory_space<vmem>>, vector<1x64x16xf32>
    %4 = vector.shape_cast %3 : vector<1x64x16xf32> to vector<64x16xf32>
    %c0_3 = arith.constant 0 : index
    %c0_4 = arith.constant 0 : index
    %5 = vector.load %arg3[%c0_3, %c0_4] : memref<16x512xf32, #tpu.memory_space<vmem>>, vector<16x512xf32>
    %cst = arith.constant dense<0.000000e+00> : vector<64x512xf32>
    %6 = tpu.matmul %4, %5, %cst {dimension_numbers = #tpu.dot_dimension_numbers<[1], [0], [0], [1], [0, 0, 1, 1], [], []>} : vector<64x16xf32>, vector<16x512xf32>, vector<64x512xf32> -> vector<64x512xf32>
    %c0_5 = arith.constant 0 : index
    %c0_6 = arith.constant 0 : index
    %7 = vector.load %arg5[%c0_5, %c0_6] : memref<1x512xf32, #tpu.memory_space<vmem>>, vector<1x512xf32>
    %8 = vector.broadcast %7 : vector<1x512xf32> to vector<64x512xf32>
    %9 = arith.addf %6, %8 : vector<64x512xf32>
    %c0_7 = arith.constant 0 : index
    %c0_8 = arith.constant 0 : index
    %10 = vector.load %arg11[%c0_7, %c0_8] : memref<64x512xf32, #tpu.memory_space<vmem>>, vector<64x512xf32>
    tpu.vector_store %arg11[%c0_7, %c0_8], %9 {strides = array<i32>} : memref<64x512xf32, #tpu.memory_space<vmem>>, vector<64x512xf32>,
    %c0_9 = arith.constant 0 : index
    %c0_10 = arith.constant 0 : index
    %11 = vector.load %arg12[%c0_9, %c0_10] : memref<8x128xf32, #tpu.memory_space<vmem>>, vector<8x128xf32>
    %c0_11 = arith.constant 0 : index
    %c0_12 = arith.constant 0 : index
    %12 = vector.load %arg13[%c0_11, %c0_12] : memref<8x128xf32, #tpu.memory_space<vmem>>, vector<8x128xf32>
    %c0_i32_13 = arith.constant 0 : i32
    %c8_i32 = arith.constant 8 : i32
    %13 = arith.muli %c0_i32_13, %c8_i32 : i32
    %14 = tpu.assume_multiple %13, 8 : i32
    %15 = arith.index_cast %14 : i32 to index
    %c0_14 = arith.constant 0 : index
    %16 = vector.load %arg11[%15, %c0_14] : memref<64x512xf32, #tpu.memory_space<vmem>>, vector<8x512xf32>
    %c0_15 = arith.constant 0 : index
    %c0_16 = arith.constant 0 : index
    %17 = vector.load %arg4[%c0_15, %c0_16] : memref<128x512xf32, #tpu.memory_space<vmem>>, vector<128x512xf32>
    %cst_17 = arith.constant dense<0.000000e+00> : vector<8x512xf32>
    %18 = tpu.matmul %11, %17, %cst_17 {dimension_numbers = #tpu.dot_dimension_numbers<[1], [0], [0], [1], [0, 0, 1, 1], [], []>} : vector<8x128xf32>, vector<128x512xf32>, vector<8x512xf32> -> vector<8x512xf32>
    %19 = arith.addf %16, %18 : vector<8x512xf32>
    %20 = vector.extract_strided_slice %19 {offsets = [0, 0], sizes = [8, 128], strides = [1, 1]} : vector<8x512xf32> to vector<8x128xf32>
    %21 = arith.negf %20 : vector<8x128xf32>
    %22 = math.exp %21 : vector<8x128xf32>
    %cst_18 = arith.constant 1.000000e+00 : f32
    %23 = vector.broadcast %cst_18 : f32 to vector<8x128xf32>
    %24 = arith.addf %23, %22 : vector<8x128xf32>
    %25 = arith.divf %23, %24 : vector<8x128xf32>
    %26 = vector.extract_strided_slice %19 {offsets = [0, 128], sizes = [8, 128], strides = [1, 1]} : vector<8x512xf32> to vector<8x128xf32>
    %27 = arith.negf %26 : vector<8x128xf32>
    %28 = math.exp %27 : vector<8x128xf32>
    %cst_19 = arith.constant 1.000000e+00 : f32
    %29 = vector.broadcast %cst_19 : f32 to vector<8x128xf32>
    %30 = arith.addf %29, %28 : vector<8x128xf32>
    %31 = arith.divf %29, %30 : vector<8x128xf32>
    %32 = vector.extract_strided_slice %19 {offsets = [0, 256], sizes = [8, 128], strides = [1, 1]} : vector<8x512xf32> to vector<8x128xf32>
    %33 = math.tanh %32 : vector<8x128xf32>
    %34 = vector.extract_strided_slice %19 {offsets = [0, 384], sizes = [8, 128], strides = [1, 1]} : vector<8x512xf32> to vector<8x128xf32>
    %35 = arith.negf %34 : vector<8x128xf32>
    %36 = math.exp %35 : vector<8x128xf32>
    %cst_20 = arith.constant 1.000000e+00 : f32
    %37 = vector.broadcast %cst_20 : f32 to vector<8x128xf32>
    %38 = arith.addf %37, %36 : vector<8x128xf32>
    %39 = arith.divf %37, %38 : vector<8x128xf32>
    %40 = arith.mulf %31, %12 : vector<8x128xf32>
    %41 = arith.mulf %25, %33 : vector<8x128xf32>
    %42 = arith.addf %40, %41 : vector<8x128xf32>
    %43 = math.tanh %42 : vector<8x128xf32>
    %44 = arith.mulf %39, %43 : vector<8x128xf32>
    %c1_i32 = arith.constant 1 : i32
    %c8_i32_21 = arith.constant 8 : i32
    %45 = arith.muli %c1_i32, %c8_i32_21 : i32
    %46 = tpu.assume_multiple %45, 8 : i32
    %47 = arith.index_cast %46 : i32 to index
    %c0_22 = arith.constant 0 : index
    %48 = vector.load %arg11[%47, %c0_22] : memref<64x512xf32, #tpu.memory_space<vmem>>, vector<8x512xf32>
    %c0_23 = arith.constant 0 : index
    %c0_24 = arith.constant 0 : index
    %49 = vector.load %arg4[%c0_23, %c0_24] : memref<128x512xf32, #tpu.memory_space<vmem>>, vector<128x512xf32>
    %cst_25 = arith.constant dense<0.000000e+00> : vector<8x512xf32>
    %50 = tpu.matmul %44, %49, %cst_25 {dimension_numbers = #tpu.dot_dimension_numbers<[1], [0], [0], [1], [0, 0, 1, 1], [], []>} : vector<8x128xf32>, vector<128x512xf32>, vector<8x512xf32> -> vector<8x512xf32>
    %51 = arith.addf %48, %50 : vector<8x512xf32>
    %52 = vector.extract_strided_slice %51 {offsets = [0, 0], sizes = [8, 128], strides = [1, 1]} : vector<8x512xf32> to vector<8x128xf32>
    %53 = arith.negf %52 : vector<8x128xf32>
    %54 = math.exp %53 : vector<8x128xf32>
    %cst_26 = arith.constant 1.000000e+00 : f32
    %55 = vector.broadcast %cst_26 : f32 to vector<8x128xf32>
    %56 = arith.addf %55, %54 : vector<8x128xf32>
    %57 = arith.divf %55, %56 : vector<8x128xf32>
    %58 = vector.extract_strided_slice %51 {offsets = [0, 128], sizes = [8, 128], strides = [1, 1]} : vector<8x512xf32> to vector<8x128xf32>
    %59 = arith.negf %58 : vector<8x128xf32>
    %60 = math.exp %59 : vector<8x128xf32>
    %cst_27 = arith.constant 1.000000e+00 : f32
    %61 = vector.broadcast %cst_27 : f32 to vector<8x128xf32>
    %62 = arith.addf %61, %60 : vector<8x128xf32>
    %63 = arith.divf %61, %62 : vector<8x128xf32>
    %64 = vector.extract_strided_slice %51 {offsets = [0, 256], sizes = [8, 128], strides = [1, 1]} : vector<8x512xf32> to vector<8x128xf32>
    %65 = math.tanh %64 : vector<8x128xf32>
    %66 = vector.extract_strided_slice %51 {offsets = [0, 384], sizes = [8, 128], strides = [1, 1]} : vector<8x512xf32> to vector<8x128xf32>
    %67 = arith.negf %66 : vector<8x128xf32>
    %68 = math.exp %67 : vector<8x128xf32>
    %cst_28 = arith.constant 1.000000e+00 : f32
    %69 = vector.broadcast %cst_28 : f32 to vector<8x128xf32>
    %70 = arith.addf %69, %68 : vector<8x128xf32>
    %71 = arith.divf %69, %70 : vector<8x128xf32>
    %72 = arith.mulf %63, %42 : vector<8x128xf32>
    %73 = arith.mulf %57, %65 : vector<8x128xf32>
    %74 = arith.addf %72, %73 : vector<8x128xf32>
    %75 = math.tanh %74 : vector<8x128xf32>
    %76 = arith.mulf %71, %75 : vector<8x128xf32>
    %c2_i32 = arith.constant 2 : i32
    %c8_i32_29 = arith.constant 8 : i32
    %77 = arith.muli %c2_i32, %c8_i32_29 : i32
    %78 = tpu.assume_multiple %77, 8 : i32
    %79 = arith.index_cast %78 : i32 to index
    %c0_30 = arith.constant 0 : index
    %80 = vector.load %arg11[%79, %c0_30] : memref<64x512xf32, #tpu.memory_space<vmem>>, vector<8x512xf32>
    %c0_31 = arith.constant 0 : index
    %c0_32 = arith.constant 0 : index
    %81 = vector.load %arg4[%c0_31, %c0_32] : memref<128x512xf32, #tpu.memory_space<vmem>>, vector<128x512xf32>
    %cst_33 = arith.constant dense<0.000000e+00> : vector<8x512xf32>
    %82 = tpu.matmul %76, %81, %cst_33 {dimension_numbers = #tpu.dot_dimension_numbers<[1], [0], [0], [1], [0, 0, 1, 1], [], []>} : vector<8x128xf32>, vector<128x512xf32>, vector<8x512xf32> -> vector<8x512xf32>
    %83 = arith.addf %80, %82 : vector<8x512xf32>
    %84 = vector.extract_strided_slice %83 {offsets = [0, 0], sizes = [8, 128], strides = [1, 1]} : vector<8x512xf32> to vector<8x128xf32>
    %85 = arith.negf %84 : vector<8x128xf32>
    %86 = math.exp %85 : vector<8x128xf32>
    %cst_34 = arith.constant 1.000000e+00 : f32
    %87 = vector.broadcast %cst_34 : f32 to vector<8x128xf32>
    %88 = arith.addf %87, %86 : vector<8x128xf32>
    %89 = arith.divf %87, %88 : vector<8x128xf32>
    %90 = vector.extract_strided_slice %83 {offsets = [0, 128], sizes = [8, 128], strides = [1, 1]} : vector<8x512xf32> to vector<8x128xf32>
    %91 = arith.negf %90 : vector<8x128xf32>
    %92 = math.exp %91 : vector<8x128xf32>
    %cst_35 = arith.constant 1.000000e+00 : f32
    %93 = vector.broadcast %cst_35 : f32 to vector<8x128xf32>
    %94 = arith.addf %93, %92 : vector<8x128xf32>
    %95 = arith.divf %93, %94 : vector<8x128xf32>
    %96 = vector.extract_strided_slice %83 {offsets = [0, 256], sizes = [8, 128], strides = [1, 1]} : vector<8x512xf32> to vector<8x128xf32>
    %97 = math.tanh %96 : vector<8x128xf32>
    %98 = vector.extract_strided_slice %83 {offsets = [0, 384], sizes = [8, 128], strides = [1, 1]} : vector<8x512xf32> to vector<8x128xf32>
    %99 = arith.negf %98 : vector<8x128xf32>
    %100 = math.exp %99 : vector<8x128xf32>
    %cst_36 = arith.constant 1.000000e+00 : f32
    %101 = vector.broadcast %cst_36 : f32 to vector<8x128xf32>
    %102 = arith.addf %101, %100 : vector<8x128xf32>
    %103 = arith.divf %101, %102 : vector<8x128xf32>
    %104 = arith.mulf %95, %74 : vector<8x128xf32>
    %105 = arith.mulf %89, %97 : vector<8x128xf32>
    %106 = arith.addf %104, %105 : vector<8x128xf32>
    %107 = math.tanh %106 : vector<8x128xf32>
    %108 = arith.mulf %103, %107 : vector<8x128xf32>
    %c3_i32 = arith.constant 3 : i32
    %c8_i32_37 = arith.constant 8 : i32
    %109 = arith.muli %c3_i32, %c8_i32_37 : i32
    %110 = tpu.assume_multiple %109, 8 : i32
    %111 = arith.index_cast %110 : i32 to index
    %c0_38 = arith.constant 0 : index
    %112 = vector.load %arg11[%111, %c0_38] : memref<64x512xf32, #tpu.memory_space<vmem>>, vector<8x512xf32>
    %c0_39 = arith.constant 0 : index
    %c0_40 = arith.constant 0 : index
    %113 = vector.load %arg4[%c0_39, %c0_40] : memref<128x512xf32, #tpu.memory_space<vmem>>, vector<128x512xf32>
    %cst_41 = arith.constant dense<0.000000e+00> : vector<8x512xf32>
    %114 = tpu.matmul %108, %113, %cst_41 {dimension_numbers = #tpu.dot_dimension_numbers<[1], [0], [0], [1], [0, 0, 1, 1], [], []>} : vector<8x128xf32>, vector<128x512xf32>, vector<8x512xf32> -> vector<8x512xf32>
    %115 = arith.addf %112, %114 : vector<8x512xf32>
    %116 = vector.extract_strided_slice %115 {offsets = [0, 0], sizes = [8, 128], strides = [1, 1]} : vector<8x512xf32> to vector<8x128xf32>
    %117 = arith.negf %116 : vector<8x128xf32>
    %118 = math.exp %117 : vector<8x128xf32>
    %cst_42 = arith.constant 1.000000e+00 : f32
    %119 = vector.broadcast %cst_42 : f32 to vector<8x128xf32>
    %120 = arith.addf %119, %118 : vector<8x128xf32>
    %121 = arith.divf %119, %120 : vector<8x128xf32>
    %122 = vector.extract_strided_slice %115 {offsets = [0, 128], sizes = [8, 128], strides = [1, 1]} : vector<8x512xf32> to vector<8x128xf32>
    %123 = arith.negf %122 : vector<8x128xf32>
    %124 = math.exp %123 : vector<8x128xf32>
    %cst_43 = arith.constant 1.000000e+00 : f32
    %125 = vector.broadcast %cst_43 : f32 to vector<8x128xf32>
    %126 = arith.addf %125, %124 : vector<8x128xf32>
    %127 = arith.divf %125, %126 : vector<8x128xf32>
    %128 = vector.extract_strided_slice %115 {offsets = [0, 256], sizes = [8, 128], strides = [1, 1]} : vector<8x512xf32> to vector<8x128xf32>
    %129 = math.tanh %128 : vector<8x128xf32>
    %130 = vector.extract_strided_slice %115 {offsets = [0, 384], sizes = [8, 128], strides = [1, 1]} : vector<8x512xf32> to vector<8x128xf32>
    %131 = arith.negf %130 : vector<8x128xf32>
    %132 = math.exp %131 : vector<8x128xf32>
    %cst_44 = arith.constant 1.000000e+00 : f32
    %133 = vector.broadcast %cst_44 : f32 to vector<8x128xf32>
    %134 = arith.addf %133, %132 : vector<8x128xf32>
    %135 = arith.divf %133, %134 : vector<8x128xf32>
    %136 = arith.mulf %127, %106 : vector<8x128xf32>
    %137 = arith.mulf %121, %129 : vector<8x128xf32>
    %138 = arith.addf %136, %137 : vector<8x128xf32>
    %139 = math.tanh %138 : vector<8x128xf32>
    %140 = arith.mulf %135, %139 : vector<8x128xf32>
    %c4_i32 = arith.constant 4 : i32
    %c8_i32_45 = arith.constant 8 : i32
    %141 = arith.muli %c4_i32, %c8_i32_45 : i32
    %142 = tpu.assume_multiple %141, 8 : i32
    %143 = arith.index_cast %142 : i32 to index
    %c0_46 = arith.constant 0 : index
    %144 = vector.load %arg11[%143, %c0_46] : memref<64x512xf32, #tpu.memory_space<vmem>>, vector<8x512xf32>
    %c0_47 = arith.constant 0 : index
    %c0_48 = arith.constant 0 : index
    %145 = vector.load %arg4[%c0_47, %c0_48] : memref<128x512xf32, #tpu.memory_space<vmem>>, vector<128x512xf32>
    %cst_49 = arith.constant dense<0.000000e+00> : vector<8x512xf32>
    %146 = tpu.matmul %140, %145, %cst_49 {dimension_numbers = #tpu.dot_dimension_numbers<[1], [0], [0], [1], [0, 0, 1, 1], [], []>} : vector<8x128xf32>, vector<128x512xf32>, vector<8x512xf32> -> vector<8x512xf32>
    %147 = arith.addf %144, %146 : vector<8x512xf32>
    %148 = vector.extract_strided_slice %147 {offsets = [0, 0], sizes = [8, 128], strides = [1, 1]} : vector<8x512xf32> to vector<8x128xf32>
    %149 = arith.negf %148 : vector<8x128xf32>
    %150 = math.exp %149 : vector<8x128xf32>
    %cst_50 = arith.constant 1.000000e+00 : f32
    %151 = vector.broadcast %cst_50 : f32 to vector<8x128xf32>
    %152 = arith.addf %151, %150 : vector<8x128xf32>
    %153 = arith.divf %151, %152 : vector<8x128xf32>
    %154 = vector.extract_strided_slice %147 {offsets = [0, 128], sizes = [8, 128], strides = [1, 1]} : vector<8x512xf32> to vector<8x128xf32>
    %155 = arith.negf %154 : vector<8x128xf32>
    %156 = math.exp %155 : vector<8x128xf32>
    %cst_51 = arith.constant 1.000000e+00 : f32
    %157 = vector.broadcast %cst_51 : f32 to vector<8x128xf32>
    %158 = arith.addf %157, %156 : vector<8x128xf32>
    %159 = arith.divf %157, %158 : vector<8x128xf32>
    %160 = vector.extract_strided_slice %147 {offsets = [0, 256], sizes = [8, 128], strides = [1, 1]} : vector<8x512xf32> to vector<8x128xf32>
    %161 = math.tanh %160 : vector<8x128xf32>
    %162 = vector.extract_strided_slice %147 {offsets = [0, 384], sizes = [8, 128], strides = [1, 1]} : vector<8x512xf32> to vector<8x128xf32>
    %163 = arith.negf %162 : vector<8x128xf32>
    %164 = math.exp %163 : vector<8x128xf32>
    %cst_52 = arith.constant 1.000000e+00 : f32
    %165 = vector.broadcast %cst_52 : f32 to vector<8x128xf32>
    %166 = arith.addf %165, %164 : vector<8x128xf32>
    %167 = arith.divf %165, %166 : vector<8x128xf32>
    %168 = arith.mulf %159, %138 : vector<8x128xf32>
    %169 = arith.mulf %153, %161 : vector<8x128xf32>
    %170 = arith.addf %168, %169 : vector<8x128xf32>
    %171 = math.tanh %170 : vector<8x128xf32>
    %172 = arith.mulf %167, %171 : vector<8x128xf32>
    %c5_i32 = arith.constant 5 : i32
    %c8_i32_53 = arith.constant 8 : i32
    %173 = arith.muli %c5_i32, %c8_i32_53 : i32
    %174 = tpu.assume_multiple %173, 8 : i32
    %175 = arith.index_cast %174 : i32 to index
    %c0_54 = arith.constant 0 : index
    %176 = vector.load %arg11[%175, %c0_54] : memref<64x512xf32, #tpu.memory_space<vmem>>, vector<8x512xf32>
    %c0_55 = arith.constant 0 : index
    %c0_56 = arith.constant 0 : index
    %177 = vector.load %arg4[%c0_55, %c0_56] : memref<128x512xf32, #tpu.memory_space<vmem>>, vector<128x512xf32>
    %cst_57 = arith.constant dense<0.000000e+00> : vector<8x512xf32>
    %178 = tpu.matmul %172, %177, %cst_57 {dimension_numbers = #tpu.dot_dimension_numbers<[1], [0], [0], [1], [0, 0, 1, 1], [], []>} : vector<8x128xf32>, vector<128x512xf32>, vector<8x512xf32> -> vector<8x512xf32>
    %179 = arith.addf %176, %178 : vector<8x512xf32>
    %180 = vector.extract_strided_slice %179 {offsets = [0, 0], sizes = [8, 128], strides = [1, 1]} : vector<8x512xf32> to vector<8x128xf32>
    %181 = arith.negf %180 : vector<8x128xf32>
    %182 = math.exp %181 : vector<8x128xf32>
    %cst_58 = arith.constant 1.000000e+00 : f32
    %183 = vector.broadcast %cst_58 : f32 to vector<8x128xf32>
    %184 = arith.addf %183, %182 : vector<8x128xf32>
    %185 = arith.divf %183, %184 : vector<8x128xf32>
    %186 = vector.extract_strided_slice %179 {offsets = [0, 128], sizes = [8, 128], strides = [1, 1]} : vector<8x512xf32> to vector<8x128xf32>
    %187 = arith.negf %186 : vector<8x128xf32>
    %188 = math.exp %187 : vector<8x128xf32>
    %cst_59 = arith.constant 1.000000e+00 : f32
    %189 = vector.broadcast %cst_59 : f32 to vector<8x128xf32>
    %190 = arith.addf %189, %188 : vector<8x128xf32>
    %191 = arith.divf %189, %190 : vector<8x128xf32>
    %192 = vector.extract_strided_slice %179 {offsets = [0, 256], sizes = [8, 128], strides = [1, 1]} : vector<8x512xf32> to vector<8x128xf32>
    %193 = math.tanh %192 : vector<8x128xf32>
    %194 = vector.extract_strided_slice %179 {offsets = [0, 384], sizes = [8, 128], strides = [1, 1]} : vector<8x512xf32> to vector<8x128xf32>
    %195 = arith.negf %194 : vector<8x128xf32>
    %196 = math.exp %195 : vector<8x128xf32>
    %cst_60 = arith.constant 1.000000e+00 : f32
    %197 = vector.broadcast %cst_60 : f32 to vector<8x128xf32>
    %198 = arith.addf %197, %196 : vector<8x128xf32>
    %199 = arith.divf %197, %198 : vector<8x128xf32>
    %200 = arith.mulf %191, %170 : vector<8x128xf32>
    %201 = arith.mulf %185, %193 : vector<8x128xf32>
    %202 = arith.addf %200, %201 : vector<8x128xf32>
    %203 = math.tanh %202 : vector<8x128xf32>
    %204 = arith.mulf %199, %203 : vector<8x128xf32>
    %c6_i32 = arith.constant 6 : i32
    %c8_i32_61 = arith.constant 8 : i32
    %205 = arith.muli %c6_i32, %c8_i32_61 : i32
    %206 = tpu.assume_multiple %205, 8 : i32
    %207 = arith.index_cast %206 : i32 to index
    %c0_62 = arith.constant 0 : index
    %208 = vector.load %arg11[%207, %c0_62] : memref<64x512xf32, #tpu.memory_space<vmem>>, vector<8x512xf32>
    %c0_63 = arith.constant 0 : index
    %c0_64 = arith.constant 0 : index
    %209 = vector.load %arg4[%c0_63, %c0_64] : memref<128x512xf32, #tpu.memory_space<vmem>>, vector<128x512xf32>
    %cst_65 = arith.constant dense<0.000000e+00> : vector<8x512xf32>
    %210 = tpu.matmul %204, %209, %cst_65 {dimension_numbers = #tpu.dot_dimension_numbers<[1], [0], [0], [1], [0, 0, 1, 1], [], []>} : vector<8x128xf32>, vector<128x512xf32>, vector<8x512xf32> -> vector<8x512xf32>
    %211 = arith.addf %208, %210 : vector<8x512xf32>
    %212 = vector.extract_strided_slice %211 {offsets = [0, 0], sizes = [8, 128], strides = [1, 1]} : vector<8x512xf32> to vector<8x128xf32>
    %213 = arith.negf %212 : vector<8x128xf32>
    %214 = math.exp %213 : vector<8x128xf32>
    %cst_66 = arith.constant 1.000000e+00 : f32
    %215 = vector.broadcast %cst_66 : f32 to vector<8x128xf32>
    %216 = arith.addf %215, %214 : vector<8x128xf32>
    %217 = arith.divf %215, %216 : vector<8x128xf32>
    %218 = vector.extract_strided_slice %211 {offsets = [0, 128], sizes = [8, 128], strides = [1, 1]} : vector<8x512xf32> to vector<8x128xf32>
    %219 = arith.negf %218 : vector<8x128xf32>
    %220 = math.exp %219 : vector<8x128xf32>
    %cst_67 = arith.constant 1.000000e+00 : f32
    %221 = vector.broadcast %cst_67 : f32 to vector<8x128xf32>
    %222 = arith.addf %221, %220 : vector<8x128xf32>
    %223 = arith.divf %221, %222 : vector<8x128xf32>
    %224 = vector.extract_strided_slice %211 {offsets = [0, 256], sizes = [8, 128], strides = [1, 1]} : vector<8x512xf32> to vector<8x128xf32>
    %225 = math.tanh %224 : vector<8x128xf32>
    %226 = vector.extract_strided_slice %211 {offsets = [0, 384], sizes = [8, 128], strides = [1, 1]} : vector<8x512xf32> to vector<8x128xf32>
    %227 = arith.negf %226 : vector<8x128xf32>
    %228 = math.exp %227 : vector<8x128xf32>
    %cst_68 = arith.constant 1.000000e+00 : f32
    %229 = vector.broadcast %cst_68 : f32 to vector<8x128xf32>
    %230 = arith.addf %229, %228 : vector<8x128xf32>
    %231 = arith.divf %229, %230 : vector<8x128xf32>
    %232 = arith.mulf %223, %202 : vector<8x128xf32>
    %233 = arith.mulf %217, %225 : vector<8x128xf32>
    %234 = arith.addf %232, %233 : vector<8x128xf32>
    %235 = math.tanh %234 : vector<8x128xf32>
    %236 = arith.mulf %231, %235 : vector<8x128xf32>
    %c7_i32 = arith.constant 7 : i32
    %c8_i32_69 = arith.constant 8 : i32
    %237 = arith.muli %c7_i32, %c8_i32_69 : i32
    %238 = tpu.assume_multiple %237, 8 : i32
    %239 = arith.index_cast %238 : i32 to index
    %c0_70 = arith.constant 0 : index
    %240 = vector.load %arg11[%239, %c0_70] : memref<64x512xf32, #tpu.memory_space<vmem>>, vector<8x512xf32>
    %c0_71 = arith.constant 0 : index
    %c0_72 = arith.constant 0 : index
    %241 = vector.load %arg4[%c0_71, %c0_72] : memref<128x512xf32, #tpu.memory_space<vmem>>, vector<128x512xf32>
    %cst_73 = arith.constant dense<0.000000e+00> : vector<8x512xf32>
    %242 = tpu.matmul %236, %241, %cst_73 {dimension_numbers = #tpu.dot_dimension_numbers<[1], [0], [0], [1], [0, 0, 1, 1], [], []>} : vector<8x128xf32>, vector<128x512xf32>, vector<8x512xf32> -> vector<8x512xf32>
    %243 = arith.addf %240, %242 : vector<8x512xf32>
    %244 = vector.extract_strided_slice %243 {offsets = [0, 0], sizes = [8, 128], strides = [1, 1]} : vector<8x512xf32> to vector<8x128xf32>
    %245 = arith.negf %244 : vector<8x128xf32>
    %246 = math.exp %245 : vector<8x128xf32>
    %cst_74 = arith.constant 1.000000e+00 : f32
    %247 = vector.broadcast %cst_74 : f32 to vector<8x128xf32>
    %248 = arith.addf %247, %246 : vector<8x128xf32>
    %249 = arith.divf %247, %248 : vector<8x128xf32>
    %250 = vector.extract_strided_slice %243 {offsets = [0, 128], sizes = [8, 128], strides = [1, 1]} : vector<8x512xf32> to vector<8x128xf32>
    %251 = arith.negf %250 : vector<8x128xf32>
    %252 = math.exp %251 : vector<8x128xf32>
    %cst_75 = arith.constant 1.000000e+00 : f32
    %253 = vector.broadcast %cst_75 : f32 to vector<8x128xf32>
    %254 = arith.addf %253, %252 : vector<8x128xf32>
    %255 = arith.divf %253, %254 : vector<8x128xf32>
    %256 = vector.extract_strided_slice %243 {offsets = [0, 256], sizes = [8, 128], strides = [1, 1]} : vector<8x512xf32> to vector<8x128xf32>
    %257 = math.tanh %256 : vector<8x128xf32>
    %258 = vector.extract_strided_slice %243 {offsets = [0, 384], sizes = [8, 128], strides = [1, 1]} : vector<8x512xf32> to vector<8x128xf32>
    %259 = arith.negf %258 : vector<8x128xf32>
    %260 = math.exp %259 : vector<8x128xf32>
    %cst_76 = arith.constant 1.000000e+00 : f32
    %261 = vector.broadcast %cst_76 : f32 to vector<8x128xf32>
    %262 = arith.addf %261, %260 : vector<8x128xf32>
    %263 = arith.divf %261, %262 : vector<8x128xf32>
    %264 = arith.mulf %255, %234 : vector<8x128xf32>
    %265 = arith.mulf %249, %257 : vector<8x128xf32>
    %266 = arith.addf %264, %265 : vector<8x128xf32>
    %267 = math.tanh %266 : vector<8x128xf32>
    %268 = arith.mulf %263, %267 : vector<8x128xf32>
    %c8_i32_77 = arith.constant 8 : i32
    %c0_78 = arith.constant 0 : index
    %c0_79 = arith.constant 0 : index
    %269 = vector.load %arg12[%c0_78, %c0_79] : memref<8x128xf32, #tpu.memory_space<vmem>>, vector<8x128xf32>
    tpu.vector_store %arg12[%c0_78, %c0_79], %268 {strides = array<i32>} : memref<8x128xf32, #tpu.memory_space<vmem>>, vector<8x128xf32>,
    %c0_80 = arith.constant 0 : index
    %c0_81 = arith.constant 0 : index
    %270 = vector.load %arg13[%c0_80, %c0_81] : memref<8x128xf32, #tpu.memory_space<vmem>>, vector<8x128xf32>
    tpu.vector_store %arg13[%c0_80, %c0_81], %266 {strides = array<i32>} : memref<8x128xf32, #tpu.memory_space<vmem>>, vector<8x128xf32>,
    %c0_i32_82 = arith.constant 0 : i32
    %271 = arith.cmpi eq, %arg1, %c0_i32_82 : i32
    %272 = arith.extui %271 : i1 to i32
    %c0_i32_83 = arith.constant 0 : i32
    %273 = arith.cmpi ne, %272, %c0_i32_83 : i32
    scf.if %273 {
      %c0_84 = arith.constant 0 : index
      %c0_85 = arith.constant 0 : index
      %274 = vector.load %arg6[%c0_84, %c0_85] : memref<128x64xf32, #tpu.memory_space<vmem>>, vector<128x64xf32>
      %cst_86 = arith.constant dense<0.000000e+00> : vector<8x64xf32>
      %275 = tpu.matmul %268, %274, %cst_86 {dimension_numbers = #tpu.dot_dimension_numbers<[1], [0], [0], [1], [0, 0, 1, 1], [], []>} : vector<8x128xf32>, vector<128x64xf32>, vector<8x64xf32> -> vector<8x64xf32>
      %c0_87 = arith.constant 0 : index
      %c0_88 = arith.constant 0 : index
      %276 = vector.load %arg7[%c0_87, %c0_88] : memref<1x64xf32, #tpu.memory_space<vmem>>, vector<1x64xf32>
      %277 = vector.broadcast %276 : vector<1x64xf32> to vector<8x64xf32>
      %278 = arith.addf %275, %277 : vector<8x64xf32>
      %cst_89 = arith.constant 0.000000e+00 : f32
      %279 = vector.broadcast %cst_89 : f32 to vector<8x64xf32>
      %280 = arith.maximumf %278, %279 : vector<8x64xf32>
      %c0_90 = arith.constant 0 : index
      %c0_91 = arith.constant 0 : index
      %281 = vector.load %arg8[%c0_90, %c0_91] : memref<64x2xf32, #tpu.memory_space<vmem>>, vector<64x2xf32>
      %cst_92 = arith.constant dense<0.000000e+00> : vector<8x2xf32>
      %282 = tpu.matmul %280, %281, %cst_92 {dimension_numbers = #tpu.dot_dimension_numbers<[1], [0], [0], [1], [0, 0, 1, 1], [], []>} : vector<8x64xf32>, vector<64x2xf32>, vector<8x2xf32> -> vector<8x2xf32>
      %c0_93 = arith.constant 0 : index
      %c0_94 = arith.constant 0 : index
      %283 = vector.load %arg9[%c0_93, %c0_94] : memref<1x2xf32, #tpu.memory_space<vmem>>, vector<1x2xf32>
      %284 = vector.broadcast %283 : vector<1x2xf32> to vector<8x2xf32>
      %285 = arith.addf %282, %284 : vector<8x2xf32>
      %c0_95 = arith.constant 0 : index
      %c0_96 = arith.constant 0 : index
      %286 = vector.load %arg10[%c0_95, %c0_96] : memref<8x2xf32, #tpu.memory_space<vmem>>, vector<8x2xf32>
      tpu.vector_store %arg10[%c0_95, %c0_96], %285 {strides = array<i32>} : memref<8x2xf32, #tpu.memory_space<vmem>>, vector<8x2xf32>,
    } else {
    }
    return
  }
  func.func @transform_0(%arg0: i32, %arg1: i32) -> (i32, i32, i32) {
    %c0_i32 = arith.constant 0 : i32
    %c0_i32_0 = arith.constant 0 : i32
    return %arg0, %arg1, %c0_i32 : i32, i32, i32
  }
  func.func @transform_1(%arg0: i32, %arg1: i32) -> (i32, i32) {
    %c0_i32 = arith.constant 0 : i32
    %c0_i32_0 = arith.constant 0 : i32
    %c0_i32_1 = arith.constant 0 : i32
    return %c0_i32, %c0_i32_0 : i32, i32
  }
  func.func @transform_2(%arg0: i32, %arg1: i32) -> (i32, i32) {
    %c0_i32 = arith.constant 0 : i32
    %c0_i32_0 = arith.constant 0 : i32
    %c0_i32_1 = arith.constant 0 : i32
    return %c0_i32, %c0_i32_0 : i32, i32
  }
  func.func @transform_3(%arg0: i32, %arg1: i32) -> (i32, i32) {
    %c0_i32 = arith.constant 0 : i32
    %c0_i32_0 = arith.constant 0 : i32
    %c0_i32_1 = arith.constant 0 : i32
    return %c0_i32, %c0_i32_0 : i32, i32
  }
  func.func @transform_4(%arg0: i32, %arg1: i32) -> (i32, i32) {
    %c0_i32 = arith.constant 0 : i32
    %c0_i32_0 = arith.constant 0 : i32
    %c0_i32_1 = arith.constant 0 : i32
    return %c0_i32, %c0_i32_0 : i32, i32
  }
  func.func @transform_5(%arg0: i32, %arg1: i32) -> (i32, i32) {
    %c0_i32 = arith.constant 0 : i32
    %c0_i32_0 = arith.constant 0 : i32
    %c0_i32_1 = arith.constant 0 : i32
    return %c0_i32, %c0_i32_0 : i32, i32
  }
  func.func @transform_6(%arg0: i32, %arg1: i32) -> (i32, i32) {
    %c0_i32 = arith.constant 0 : i32
    %c0_i32_0 = arith.constant 0 : i32
    %c0_i32_1 = arith.constant 0 : i32
    return %c0_i32, %c0_i32_0 : i32, i32
  }
  func.func @transform_7(%arg0: i32, %arg1: i32) -> (i32, i32) {
    %c0_i32 = arith.constant 0 : i32
    %c0_i32_0 = arith.constant 0 : i32
    %c0_i32_1 = arith.constant 0 : i32
    return %c0_i32, %c0_i32_0 : i32, i32
  }
  func.func @transform_8(%arg0: i32, %arg1: i32) -> (i32, i32) {
    %c0_i32 = arith.constant 0 : i32
    %c0_i32_0 = arith.constant 0 : i32
    return %arg0, %c0_i32 : i32, i32
  }
}

</mosaic_0001>

<bundles_post_ra>
// kernel: tpu_custom_call.1
= control target key start
LH: loop header
LB: loop body
LE: loop exit
PB: predicated region body
PF: predicated region fallthrough
CT: control target
= control target key end

     0   :  { %13 = vsyncpa [#allocation6], 0  ;;  %s2396_s27 = smov [#allocation5]   ;;  %s3569_s0 = inlined_call_operand.vmem [shape: f32[1,64,16], index: 0, kind: input, shape index: {}]   ;;  %s3570_s1 = inlined_call_operand.vmem [shape: f32[16,512], index: 1, kind: input, shape index: {}]   ;;  %s3571_s2 = inlined_call_operand.hbm [shape: f32[128,512], index: 2, kind: input, shape index: {}]   ;;  %s3572_s3 = inlined_call_operand.vmem [shape: f32[1,512], index: 3, kind: input, shape index: {}]   ;;  %s3573_s4 = inlined_call_operand.vmem [shape: f32[128,64], index: 4, kind: input, shape index: {}]   ;;  %s3574_s5 = inlined_call_operand.vmem [shape: f32[1,64], index: 5, kind: input, shape index: {}]   ;;  %s3575_s6 = inlined_call_operand.vmem [shape: f32[64,2], index: 6, kind: input, shape index: {}]   ;;  %s3576_s7 = inlined_call_operand.vmem [shape: f32[1,2], index: 7, kind: input, shape index: {}]   ;;  %s3577_s8 = inlined_call_operand.vmem [shape: f32[8,2], index: 8, kind: output, shape index: {}]  }
   0x1   :  { %s23_s28 = sshll.u32 %s2396_s27, 4  ;;  %s24_s28 = int_to_ptr.vmem [resolvable:$true] %s23_s28 }
   0x2   :  { %s2382_s29 = scalar_lea.vmem %s24_s28, 8192  ;;  %p2387_p1 = scmp.lt.s32.totalorder %s24_s28, %s24_s28 }
   0x3   :  { %p2383_p0 = scmp.ne.s32.totalorder %s24_s28, %s2382_s29  ;;  %p2388_p2 = scmp.lt.s32.totalorder %s2382_s29, %s2382_s29 }
   0x5   :  { %p2389_p3 = por %p2388_p2, %p2387_p1 }
   0x7   :  { %p2390_p4 = pnand %p2389_p3, %p2383_p0 }
   0x9   :  { %2393 = shalt.err (!%p2390_p4)
}
   0xa   :  { %s2397_s30 = smov 512   ;;  %s2398_s9 = smov 32  }
   0xb   :  { %29 = dma.hbm_to_vmem [thread:$0]  %s3571_s2, 8192, %s24_s28, [#allocation6], %s2397_s30, %s2397_s30, %s2398_s9  }
   0xc   :  { %2394 = dma.done.wait [#allocation6], 8192  }
   0xd   :  { %2395 = vsyncadd [#allocation6], 4294959104  ;;  %v3578_v0 = vmov 0.0   ;;  %v62_v1 = vld [vmem:[%s3570_s1 + $0x28] sm:$0xff]  ;;  %v64_v2 = vld [vmem:[%s3570_s1 + $0x38] sm:$0xff]  ;;  %vm87_vm0 = vcmask 130048  }
   0xe   :  { %176 = vmatprep.mubr.f32.mxu0 %v3578_v0  ;;  %289 = vmatprep.mubr.f32.mxu1 %v3578_v0  ;;  %v61_v3 = vld [vmem:[%s3570_s1 + $0x20] sm:$0xff]  ;;  %v63_v4 = vld [vmem:[%s3570_s1 + $0x30] sm:$0xff]  ;;  %v58_v5 = vld [vmem:[%s3570_s1 + $0x8] sm:$0xff]  ;;  %vm2400_vm1 = vmmov 0   ;;  %vm1966_vm2 = vcmask 523264   ;;  %vm2040_vm3 = vcmask 15360  }
   0xf   :  { %140 = vmatprep.subr.mxu0 %v62_v1  ;;  %253 = vmatprep.subr.mxu1 %v64_v2  ;;  %v60_v6 = vld [vmem:[%s3570_s1 + $0x18] sm:$0xff]  ;;  %v57_v7 = vld [vmem:[%s3570_s1] sm:$0xff]  ;;  %v59_v8 = vld [vmem:[%s3570_s1 + $0x10] sm:$0xff] }
  0x10   :  { %141 = vmatpush1.msra.mxu0 %v61_v3  ;;  %254 = vmatpush1.msra.mxu1 %v63_v4  ;;  %v49_v9 = vld [vmem:[%s3569_s0] sm:$0xff]  ;;  %v2478_v10 = vld [vmem:[#allocation5 + $0x1e8] sm:$0xff]  ;;  %v2480_v11 = vld [vmem:[#allocation5 + $0x1f8] sm:$0xff] }
  0x11   :  { %142 = vmatprep.subr.mxu0 %v58_v5  ;;  %255 = vmatprep.subr.mxu1 %v60_v6  ;;  %3666 = vst [vmem:[#allocation8_spill] sm:$0xff] %v2478_v10  ;;  %3667 = vst [vmem:[#allocation9_spill] sm:$0xff] %v2480_v11  ;;  %v2482_v12 = vld [vmem:[#allocation5 + $0x1e0] sm:$0xff]  ;;  %v2484_v13 = vld [vmem:[#allocation5 + $0x1f0] sm:$0xff] }
  0x12   :  { %143 = vmatpush1.msra.mxu0 %v57_v7  ;;  %256 = vmatpush1.msra.mxu1 %v59_v8  ;;  %v2488_v14 = vld [vmem:[#allocation5 + $0x1c8] sm:$0xff]  ;;  %v2490_v15 = vld [vmem:[#allocation5 + $0x1d8] sm:$0xff]  ;;  %v2496_v16 = vld [vmem:[#allocation5 + $0x1c0] sm:$0xff] }
  0x13   :  { %2054 = vmatmul.mubr.msk.f32.vlgmr.msra.gmra.mxu0 %vm87_vm0, %v49_v9  ;;  %2062 = vmatmul.mubr.msk.f32.vlgmr.msra.gmra.mxu1 %vm87_vm0, %v49_v9  ;;  %v2498_v17 = vld [vmem:[#allocation5 + $0x1d0] sm:$0xff]  ;;  %v50_v18 = vld [vmem:[%s3569_s0 + $0x8] sm:$0xff]  ;;  %v2509_v20 = vld [vmem:[#allocation5 + $0x1b8] sm:$0xff] }
  0x14   :  { %443 = vmatprep.subr.mxu0 %v2478_v10  ;;  %514 = vmatprep.subr.mxu1 %v2480_v11  ;;  %v2507_v19 = vld [vmem:[#allocation5 + $0x1a8] sm:$0xff]  ;;  %v2513_v21 = vld [vmem:[#allocation5 + $0x1a0] sm:$0xff]  ;;  %v2515_v22 = vld [vmem:[#allocation5 + $0x1b0] sm:$0xff] }
  0x15   :  { %444 = vmatpush1.msra.mxu0 %v2482_v12  ;;  %515 = vmatpush1.msra.mxu1 %v2484_v13  ;;  %v2519_v23 = vld [vmem:[#allocation5 + $0x188] sm:$0xff]  ;;  %v2521_v24 = vld [vmem:[#allocation5 + $0x198] sm:$0xff]  ;;  %v2527_v25 = vld [vmem:[#allocation5 + $0x180] sm:$0xff] }
  0x16   :  { %445 = vmatprep.subr.mxu0 %v2488_v14  ;;  %516 = vmatprep.subr.mxu1 %v2490_v15  ;;  %v2529_v26 = vld [vmem:[#allocation5 + $0x190] sm:$0xff]  ;;  %v2538_v28 = vld [vmem:[#allocation5 + $0x168] sm:$0xff]  ;;  %v2540_v29 = vld [vmem:[#allocation5 + $0x178] sm:$0xff] }
  0x17   :  { %182 = vmatprep.mubr.f32.mxu0 %v3578_v0  ;;  %295 = vmatprep.mubr.f32.mxu1 %v3578_v0  ;;  %v51_v27 = vld [vmem:[%s3569_s0 + $0x10] sm:$0xff]  ;;  %v2544_v30 = vld [vmem:[#allocation5 + $0x160] sm:$0xff]  ;;  %v2550_v32 = vld [vmem:[#allocation5 + $0x148] sm:$0xff] }
  0x18   :  { %446 = vmatpush1.msra.mxu0 %v2496_v16  ;;  %517 = vmatpush1.msra.mxu1 %v2498_v17  ;;  %v2546_v31 = vld [vmem:[#allocation5 + $0x170] sm:$0xff]  ;;  %v2552_v33 = vld [vmem:[#allocation5 + $0x158] sm:$0xff]  ;;  %v2558_v34 = vld [vmem:[#allocation5 + $0x140] sm:$0xff] }
  0x19   :  { %2055 = vmatmul.mubr.msk.f32.gmra.mxu0 %vm87_vm0, %v50_v18  ;;  %2063 = vmatmul.mubr.msk.f32.gmra.mxu1 %vm87_vm0, %v50_v18  ;;  %v2560_v35 = vld [vmem:[#allocation5 + $0x150] sm:$0xff]  ;;  %v52_v36 = vld [vmem:[%s3569_s0 + $0x18] sm:$0xff]  ;;  %v2569_v37 = vld [vmem:[#allocation5 + $0x128] sm:$0xff] }
  0x1a   :  { %447 = vmatprep.subr.mxu0 %v2507_v19  ;;  %518 = vmatprep.subr.mxu1 %v2509_v20  ;;  %v2571_v38 = vld [vmem:[#allocation5 + $0x138] sm:$0xff]  ;;  %v2575_v39 = vld [vmem:[#allocation5 + $0x120] sm:$0xff]  ;;  %v2577_v40 = vld [vmem:[#allocation5 + $0x130] sm:$0xff] }
  0x1b   :  { %448 = vmatpush1.msra.mxu0 %v2513_v21  ;;  %519 = vmatpush1.msra.mxu1 %v2515_v22  ;;  %v2581_v41 = vld [vmem:[#allocation5 + $0x108] sm:$0xff]  ;;  %v2583_v42 = vld [vmem:[#allocation5 + $0x118] sm:$0xff]  ;;  %v2589_v43 = vld [vmem:[#allocation5 + $0x100] sm:$0xff] }
  0x1c   :  { %449 = vmatprep.subr.mxu0 %v2519_v23  ;;  %520 = vmatprep.subr.mxu1 %v2521_v24  ;;  %v2591_v44 = vld [vmem:[#allocation5 + $0x110] sm:$0xff]  ;;  %v53_v45 = vld [vmem:[%s3569_s0 + $0x20] sm:$0xff]  ;;  %v2600_v46 = vld [vmem:[#allocation5 + $0xe8] sm:$0xff] }
  0x1d   :  { %188 = vmatprep.mubr.f32.mxu0 %v3578_v0  ;;  %301 = vmatprep.mubr.f32.mxu1 %v3578_v0  ;;  %v2602_v47 = vld [vmem:[#allocation5 + $0xf8] sm:$0xff]  ;;  %v2606_v48 = vld [vmem:[#allocation5 + $0xe0] sm:$0xff]  ;;  %v2608_v49 = vld [vmem:[#allocation5 + $0xf0] sm:$0xff] }
  0x1e   :  { %450 = vmatpush1.msra.mxu0 %v2527_v25  ;;  %521 = vmatpush1.msra.mxu1 %v2529_v26  ;;  %v2612_v50 = vld [vmem:[#allocation5 + $0xc8] sm:$0xff]  ;;  %v2614_v51 = vld [vmem:[#allocation5 + $0xd8] sm:$0xff]  ;;  %v2620_v52 = vld [vmem:[#allocation5 + $0xc0] sm:$0xff] }
  0x1f   :  { %2056 = vmatmul.mubr.msk.f32.gmra.mxu0 %vm87_vm0, %v51_v27  ;;  %2064 = vmatmul.mubr.msk.f32.gmra.mxu1 %vm87_vm0, %v51_v27  ;;  %v2622_v53 = vld [vmem:[#allocation5 + $0xd0] sm:$0xff]  ;;  %v54_v54 = vld [vmem:[%s3569_s0 + $0x28] sm:$0xff]  ;;  %v2633_v56 = vld [vmem:[#allocation5 + $0xb8] sm:$0xff] }
  0x20   :  { %451 = vmatprep.subr.mxu0 %v2538_v28  ;;  %522 = vmatprep.subr.mxu1 %v2540_v29  ;;  %v2631_v55 = vld [vmem:[#allocation5 + $0xa8] sm:$0xff]  ;;  %v2637_v57 = vld [vmem:[#allocation5 + $0xa0] sm:$0xff]  ;;  %v2639_v58 = vld [vmem:[#allocation5 + $0xb0] sm:$0xff] }
  0x21   :  { %452 = vmatpush1.msra.mxu0 %v2544_v30  ;;  %523 = vmatpush1.msra.mxu1 %v2546_v31  ;;  %v2643_v59 = vld [vmem:[#allocation5 + $0x88] sm:$0xff]  ;;  %v2645_v60 = vld [vmem:[#allocation5 + $0x98] sm:$0xff]  ;;  %v2651_v61 = vld [vmem:[#allocation5 + $0x80] sm:$0xff] }
  0x22   :  { %453 = vmatprep.subr.mxu0 %v2550_v32  ;;  %524 = vmatprep.subr.mxu1 %v2552_v33  ;;  %3668 = vst [vmem:[#allocation10_spill] sm:$0xff] %v2643_v59  ;;  %3669 = vst [vmem:[#allocation11_spill] sm:$0xff] %v2645_v60  ;;  %v2653_v62 = vld [vmem:[#allocation5 + $0x90] sm:$0xff]  ;;  %v2662_v1 = vld [vmem:[#allocation5 + $0x68] sm:$0xff] }
  0x23   :  { %194 = vmatprep.mubr.f32.mxu0 %v3578_v0  ;;  %307 = vmatprep.mubr.f32.mxu1 %v3578_v0  ;;  %3670 = vst [vmem:[#allocation12_spill] sm:$0xff] %v2651_v61  ;;  %3671 = vst [vmem:[#allocation13_spill] sm:$0xff] %v2653_v62  ;;  %v55_v63 = vld [vmem:[%s3569_s0 + $0x30] sm:$0xff]  ;;  %v2664_v2 = vld [vmem:[#allocation5 + $0x78] sm:$0xff] }
  0x24   :  { %454 = vmatpush1.msra.mxu0 %v2558_v34  ;;  %525 = vmatpush1.msra.mxu1 %v2560_v35  ;;  %3672 = vst [vmem:[#allocation14_spill] sm:$0xff] %v2662_v1  ;;  %3673 = vst [vmem:[#allocation15_spill] sm:$0xff] %v2664_v2  ;;  %v2668_v3 = vld [vmem:[#allocation5 + $0x60] sm:$0xff]  ;;  %v2670_v4 = vld [vmem:[#allocation5 + $0x70] sm:$0xff] }
  0x25   :  { %2057 = vmatmul.mubr.msk.f32.gmra.mxu0 %vm87_vm0, %v52_v36  ;;  %2065 = vmatmul.mubr.msk.f32.gmra.mxu1 %vm87_vm0, %v52_v36  ;;  %3674 = vst [vmem:[#allocation16_spill] sm:$0xff] %v2668_v3  ;;  %3675 = vst [vmem:[#allocation17_spill] sm:$0xff] %v2670_v4  ;;  %v2674_v5 = vld [vmem:[#allocation5 + $0x48] sm:$0xff]  ;;  %v2676_v6 = vld [vmem:[#allocation5 + $0x58] sm:$0xff] }
  0x26   :  { %455 = vmatprep.subr.mxu0 %v2569_v37  ;;  %526 = vmatprep.subr.mxu1 %v2571_v38  ;;  %3676 = vst [vmem:[#allocation18_spill] sm:$0xff] %v2674_v5  ;;  %3677 = vst [vmem:[#allocation19_spill] sm:$0xff] %v2676_v6  ;;  %v2682_v7 = vld [vmem:[#allocation5 + $0x40] sm:$0xff]  ;;  %v2684_v8 = vld [vmem:[#allocation5 + $0x50] sm:$0xff] }
  0x27   :  { %456 = vmatpush1.msra.mxu0 %v2575_v39  ;;  %527 = vmatpush1.msra.mxu1 %v2577_v40  ;;  %3678 = vst [vmem:[#allocation20_spill] sm:$0xff] %v2682_v7  ;;  %3679 = vst [vmem:[#allocation21_spill] sm:$0xff] %v2684_v8  ;;  %v56_v9 = vld [vmem:[%s3569_s0 + $0x38] sm:$0xff]  ;;  %v2693_v18 = vld [vmem:[#allocation5 + $0x28] sm:$0xff] }
  0x28   :  { %457 = vmatprep.subr.mxu0 %v2581_v41  ;;  %528 = vmatprep.subr.mxu1 %v2583_v42  ;;  %3680 = vst [vmem:[#allocation22_spill] sm:$0xff] %v2693_v18  ;;  %v2695_v27 = vld [vmem:[#allocation5 + $0x38] sm:$0xff]  ;;  %v2699_v36 = vld [vmem:[#allocation5 + $0x20] sm:$0xff] }
  0x29   :  { %200 = vmatprep.mubr.f32.mxu0 %v3578_v0  ;;  %313 = vmatprep.mubr.f32.mxu1 %v3578_v0  ;;  %3681 = vst [vmem:[#allocation23_spill] sm:$0xff] %v2695_v27  ;;  %3682 = vst [vmem:[#allocation24_spill] sm:$0xff] %v2699_v36 }
  0x2a   :  { %458 = vmatpush1.msra.mxu0 %v2589_v43  ;;  %529 = vmatpush1.msra.mxu1 %v2591_v44 }
  0x2b   :  { %2058 = vmatmul.mubr.msk.f32.gmra.mxu0 %vm87_vm0, %v53_v45  ;;  %2066 = vmatmul.mubr.msk.f32.gmra.mxu1 %vm87_vm0, %v53_v45  ;;  %v2701_v45 = vld [vmem:[#allocation5 + $0x30] sm:$0xff] }
  0x2c   :  { %459 = vmatprep.subr.mxu0 %v2600_v46  ;;  %530 = vmatprep.subr.mxu1 %v2602_v47  ;;  %3683 = vst [vmem:[#allocation25_spill] sm:$0xff] %v2701_v45 }
  0x2d   :  { %460 = vmatpush1.msra.mxu0 %v2606_v48  ;;  %531 = vmatpush1.msra.mxu1 %v2608_v49 }
  0x2e   :  { %461 = vmatprep.subr.mxu0 %v2612_v50  ;;  %532 = vmatprep.subr.mxu1 %v2614_v51 }
  0x2f   :  { %206 = vmatprep.mubr.f32.mxu0 %v3578_v0  ;;  %319 = vmatprep.mubr.f32.mxu1 %v3578_v0 }
  0x30   :  { %462 = vmatpush1.msra.mxu0 %v2620_v52  ;;  %533 = vmatpush1.msra.mxu1 %v2622_v53 }
  0x31   :  { %2059 = vmatmul.mubr.msk.f32.gmra.mxu0 %vm87_vm0, %v54_v54  ;;  %2067 = vmatmul.mubr.msk.f32.gmra.mxu1 %vm87_vm0, %v54_v54  ;;  %v2705_v54 = vld [vmem:[#allocation5 + $0x8] sm:$0xff] }
  0x32   :  { %463 = vmatprep.subr.mxu0 %v2631_v55  ;;  %534 = vmatprep.subr.mxu1 %v2633_v56  ;;  %3684 = vst [vmem:[#allocation26_spill] sm:$0xff] %v2705_v54 }
  0x33   :  { %464 = vmatpush1.msra.mxu0 %v2637_v57  ;;  %535 = vmatpush1.msra.mxu1 %v2639_v58 }
  0x34   :  { %465 = vmatprep.subr.mxu0 %v2643_v59  ;;  %536 = vmatprep.subr.mxu1 %v2645_v60 }
  0x35   :  { %212 = vmatprep.mubr.f32.mxu0 %v3578_v0  ;;  %325 = vmatprep.mubr.f32.mxu1 %v3578_v0 }
  0x36   :  { %466 = vmatpush1.msra.mxu0 %v2651_v61  ;;  %537 = vmatpush1.msra.mxu1 %v2653_v62 }
  0x37   :  { %2060 = vmatmul.mubr.msk.f32.gmra.mxu0 %vm87_vm0, %v55_v63  ;;  %2068 = vmatmul.mubr.msk.f32.gmra.mxu1 %vm87_vm0, %v55_v63  ;;  %v2707_v63 = vld [vmem:[#allocation5 + $0x18] sm:$0xff] }
  0x38   :  { %467 = vmatprep.subr.mxu0 %v2662_v1  ;;  %538 = vmatprep.subr.mxu1 %v2664_v2  ;;  %3685 = vst [vmem:[#allocation27_spill] sm:$0xff] %v2707_v63 }
  0x39   :  { %468 = vmatpush1.msra.mxu0 %v2668_v3  ;;  %539 = vmatpush1.msra.mxu1 %v2670_v4 }
  0x3a   :  { %469 = vmatprep.subr.mxu0 %v2674_v5  ;;  %540 = vmatprep.subr.mxu1 %v2676_v6 }
  0x3b   :  { %218 = vmatprep.mubr.f32.mxu0 %v3578_v0  ;;  %331 = vmatprep.mubr.f32.mxu1 %v3578_v0  ;;  %v2711_v0 = vld [vmem:[#allocation5] sm:$0xff] }
  0x3c   :  { %470 = vmatpush1.msra.mxu0 %v2682_v7  ;;  %541 = vmatpush1.msra.mxu1 %v2684_v8  ;;  %3686 = vst [vmem:[#allocation28_spill] sm:$0xff] %v2711_v0  ;;  %v2715_v8 = vld [vmem:[#allocation5 + $0x10] sm:$0xff] }
  0x3d   :  { %2061 = vmatmul.mubr.msk.f32.gmra.mxu0 %vm87_vm0, %v56_v9  ;;  %2069 = vmatmul.mubr.msk.f32.gmra.mxu1 %vm87_vm0, %v56_v9  ;;  %3687 = vst [vmem:[#allocation29_spill] sm:$0xff] %v2715_v8  ;;  %v3688_v9 = vmov 0.0  }
  0x3e   :  { %471 = vmatprep.subr.mxu0 %v2693_v18  ;;  %542 = vmatprep.subr.mxu1 %v2695_v27 }
  0x3f   :  { %472 = vmatpush1.msra.mxu0 %v2699_v36  ;;  %543 = vmatpush1.msra.mxu1 %v2701_v45 }
  0x40   :  { %473 = vmatprep.subr.mxu0 %v2705_v54  ;;  %544 = vmatprep.subr.mxu1 %v2707_v63 }
  0x41   :  { %474 = vmatpush1.msra.mxu0 %v2711_v0  ;;  %507 = vmatprep.mubr.f32.mxu0 %v3688_v9 }
  0x42   :  { %545 = vmatpush1.msra.mxu1 %v2715_v8  ;;  %578 = vmatprep.mubr.f32.mxu1 %v3688_v9 }
  0x43   :  { %508 = vmatmul.mubr.f32.vlgmr.msra.gmra.mxu0 %v3688_v9  ;;  %579 = vmatmul.mubr.f32.vlgmr.msra.gmra.mxu1 %v3688_v9 }
  0x44   :  { %620 = vmatprep.subr.mxu0 %v2478_v10  ;;  %691 = vmatprep.subr.mxu1 %v2480_v11 }
  0x45   :  { %621 = vmatpush1.msra.mxu0 %v2482_v12  ;;  %692 = vmatpush1.msra.mxu1 %v2484_v13 }
  0x46   :  { %622 = vmatprep.subr.mxu0 %v2488_v14  ;;  %693 = vmatprep.subr.mxu1 %v2490_v15 }
  0x47   :  { %623 = vmatpush1.msra.mxu0 %v2496_v16  ;;  %694 = vmatpush1.msra.mxu1 %v2498_v17 }
  0x48   :  { %624 = vmatprep.subr.mxu0 %v2507_v19  ;;  %695 = vmatprep.subr.mxu1 %v2509_v20 }
  0x49   :  { %625 = vmatpush1.msra.mxu0 %v2513_v21  ;;  %696 = vmatpush1.msra.mxu1 %v2515_v22 }
  0x4a   :  { %626 = vmatprep.subr.mxu0 %v2519_v23  ;;  %697 = vmatprep.subr.mxu1 %v2521_v24 }
  0x4b   :  { %627 = vmatpush1.msra.mxu0 %v2527_v25  ;;  %698 = vmatpush1.msra.mxu1 %v2529_v26 }
  0x4c   :  { %628 = vmatprep.subr.mxu0 %v2538_v28  ;;  %699 = vmatprep.subr.mxu1 %v2540_v29 }
  0x4d   :  { %629 = vmatpush1.msra.mxu0 %v2544_v30  ;;  %700 = vmatpush1.msra.mxu1 %v2546_v31 }
  0x4e   :  { %630 = vmatprep.subr.mxu0 %v2550_v32  ;;  %701 = vmatprep.subr.mxu1 %v2552_v33 }
  0x4f   :  { %631 = vmatpush1.msra.mxu0 %v2558_v34  ;;  %702 = vmatpush1.msra.mxu1 %v2560_v35 }
  0x50   :  { %632 = vmatprep.subr.mxu0 %v2569_v37  ;;  %703 = vmatprep.subr.mxu1 %v2571_v38 }
  0x51   :  { %633 = vmatpush1.msra.mxu0 %v2575_v39  ;;  %704 = vmatpush1.msra.mxu1 %v2577_v40 }
  0x52   :  { %634 = vmatprep.subr.mxu0 %v2581_v41  ;;  %705 = vmatprep.subr.mxu1 %v2583_v42 }
  0x53   :  { %635 = vmatpush1.msra.mxu0 %v2589_v43  ;;  %706 = vmatpush1.msra.mxu1 %v2591_v44 }
  0x54   :  { %636 = vmatprep.subr.mxu0 %v2600_v46  ;;  %707 = vmatprep.subr.mxu1 %v2602_v47 }
  0x55   :  { %637 = vmatpush1.msra.mxu0 %v2606_v48  ;;  %708 = vmatpush1.msra.mxu1 %v2608_v49 }
  0x56   :  { %638 = vmatprep.subr.mxu0 %v2612_v50  ;;  %709 = vmatprep.subr.mxu1 %v2614_v51 }
  0x57   :  { %639 = vmatpush1.msra.mxu0 %v2620_v52  ;;  %710 = vmatpush1.msra.mxu1 %v2622_v53 }
  0x58   :  { %640 = vmatprep.subr.mxu0 %v2631_v55  ;;  %711 = vmatprep.subr.mxu1 %v2633_v56 }
  0x59   :  { %641 = vmatpush1.msra.mxu0 %v2637_v57  ;;  %712 = vmatpush1.msra.mxu1 %v2639_v58 }
  0x5a   :  { %642 = vmatprep.subr.mxu0 %v2643_v59  ;;  %713 = vmatprep.subr.mxu1 %v2645_v60  ;;  %v3689_v59 = vld [vmem:[#allocation21_spill] sm:$0xff] }
  0x5b   :  { %643 = vmatpush1.msra.mxu0 %v2651_v61  ;;  %714 = vmatpush1.msra.mxu1 %v2653_v62 }
  0x5c   :  { %644 = vmatprep.subr.mxu0 %v2662_v1  ;;  %715 = vmatprep.subr.mxu1 %v2664_v2 }
  0x5d   :  { %645 = vmatpush1.msra.mxu0 %v2668_v3  ;;  %716 = vmatpush1.msra.mxu1 %v2670_v4 }
  0x5e   :  { %646 = vmatprep.subr.mxu0 %v2674_v5  ;;  %717 = vmatprep.subr.mxu1 %v2676_v6 }
  0x5f   :  { %647 = vmatpush1.msra.mxu0 %v2682_v7  ;;  %718 = vmatpush1.msra.mxu1 %v3689_v59 }
  0x60   :  { %648 = vmatprep.subr.mxu0 %v2693_v18  ;;  %719 = vmatprep.subr.mxu1 %v2695_v27  ;;  %v67_v27 = vlaneseq }
  0x61   :  { %649 = vmatpush1.msra.mxu0 %v2699_v36  ;;  %720 = vmatpush1.msra.mxu1 %v2701_v45 }
  0x62   :  { %650 = vmatprep.subr.mxu0 %v2705_v54  ;;  %721 = vmatprep.subr.mxu1 %v2707_v63  ;;  %v68_v36 = vshrl.u32 %v67_v27, 7 }
  0x63   :  { %651 = vmatpush1.msra.mxu0 %v2711_v0  ;;  %684 = vmatprep.mubr.f32.mxu0 %v3688_v9  ;;  %v65_v0 = vld [vmem:[%s3572_s3] sm:$0xf] }
  0x64   :  { %722 = vmatpush1.msra.mxu1 %v2715_v8  ;;  %755 = vmatprep.mubr.f32.mxu1 %v3688_v9  ;;  %v69_v54 = vsub.s32 0, %v68_v36  ;;  %v77_v63 = vsub.s32 2, %v68_v36  ;;  %v73_v9 = vsub.s32 1, %v68_v36 }
  0x65   :  { %797 = vmatprep.subr.mxu0 %v2478_v10  ;;  %868 = vmatprep.subr.mxu1 %v2480_v11  ;;  %v81_v10 = vsub.s32 3, %v68_v36 }
  0x66   :  { %v70_v7 = vrot.slane %v65_v0, %v69_v54  ;;  %v2804_v11 = vrot.slane %v65_v0, %v77_v63  ;;  %v74_v5 = vrot.slane %v65_v0, %v73_v9 }
  0x67   :  { %v2806_v4 = vrot.slane %v65_v0, %v81_v10 }
  0xd3   :  { %v2793_v18 = vpop.f32.mrf.mxu0  ;;  %v2795_v45 = vpop.f32.mrf.mxu1 }
  0xd5   :  { %v2800_v59 = vpop.f32.mrf.mxu0  ;;  %v2802_v8 = vpop.f32.mrf.mxu1 }
  0xd9   :  { %v184_v27 = vpop.f32.mrf.mxu0  ;;  %v297_v6 = vpop.f32.mrf.mxu1 }
  0xda   :  { %v2808_v3 = vadd.f32 %v184_v27, %v70_v7  ;;  %v2811_v2 = vadd.f32 %v297_v6, %v2804_v11 }
  0xdb   :  { %v186_v1 = vpop.f32.mrf.mxu0  ;;  %v299_v62 = vpop.f32.mrf.mxu1 }
  0xdc   :  { %3690 = vst [vmem:[#allocation30_spill] sm:$0xff] %v2808_v3  ;;  %3691 = vst [vmem:[#allocation31_spill] sm:$0xff] %v2811_v2  ;;  %v2813_v61 = vadd.f32 %v186_v1, %v74_v5  ;;  %v2816_v60 = vadd.f32 %v299_v62, %v2806_v4 }
  0xde   :  { %3692 = vst [vmem:[#allocation32_spill] sm:$0xff] %v2813_v61  ;;  %3693 = vst [vmem:[#allocation33_spill] sm:$0xff] %v2816_v60 }
  0xdf   :  { %v190_v36 = vpop.f32.mrf.mxu0  ;;  %v303_v54 = vpop.f32.mrf.mxu1 }
  0xe0   :  { %v2818_v63 = vadd.f32 %v190_v36, %v70_v7  ;;  %v2821_v9 = vadd.f32 %v303_v54, %v2804_v11 }
  0xe1   :  { %v192_v0 = vpop.f32.mrf.mxu0  ;;  %v305_v10 = vpop.f32.mrf.mxu1 }
  0xe2   :  { %3694 = vst [vmem:[#allocation34_spill] sm:$0xff] %v2818_v63  ;;  %3695 = vst [vmem:[#allocation35_spill] sm:$0xff] %v2821_v9  ;;  %v2823_v27 = vadd.f32 %v192_v0, %v74_v5  ;;  %v2826_v6 = vadd.f32 %v305_v10, %v2806_v4 }
  0xe4   :  { %3696 = vst [vmem:[#allocation36_spill] sm:$0xff] %v2823_v27  ;;  %3697 = vst [vmem:[#allocation37_spill] sm:$0xff] %v2826_v6 }
  0xe5   :  { %v196_v2 = vpop.f32.mrf.mxu0  ;;  %v309_v1 = vpop.f32.mrf.mxu1 }
  0xe6   :  { %v2828_v61 = vadd.f32 %v196_v2, %v70_v7  ;;  %v2831_v62 = vadd.f32 %v309_v1, %v2804_v11 }
  0xe7   :  { %v198_v60 = vpop.f32.mrf.mxu0  ;;  %v311_v36 = vpop.f32.mrf.mxu1 }
  0xe8   :  { %3698 = vst [vmem:[#allocation38_spill] sm:$0xff] %v2828_v61  ;;  %3699 = vst [vmem:[#allocation39_spill] sm:$0xff] %v2831_v62  ;;  %v2833_v63 = vadd.f32 %v198_v60, %v74_v5  ;;  %v2836_v54 = vadd.f32 %v311_v36, %v2806_v4 }
  0xea   :  { %3700 = vst [vmem:[#allocation40_spill] sm:$0xff] %v2833_v63  ;;  %3701 = vst [vmem:[#allocation41_spill] sm:$0xff] %v2836_v54 }
  0xeb   :  { %v202_v9 = vpop.f32.mrf.mxu0  ;;  %v315_v0 = vpop.f32.mrf.mxu1 }
  0xec   :  { %v2838_v27 = vadd.f32 %v202_v9, %v70_v7  ;;  %v2841_v10 = vadd.f32 %v315_v0, %v2804_v11 }
  0xed   :  { %v204_v6 = vpop.f32.mrf.mxu0  ;;  %v317_v2 = vpop.f32.mrf.mxu1 }
  0xee   :  { %3702 = vst [vmem:[#allocation42_spill] sm:$0xff] %v2838_v27  ;;  %3703 = vst [vmem:[#allocation43_spill] sm:$0xff] %v2841_v10  ;;  %v2843_v61 = vadd.f32 %v204_v6, %v74_v5  ;;  %v2846_v1 = vadd.f32 %v317_v2, %v2806_v4 }
  0xf0   :  { %3704 = vst [vmem:[#allocation44_spill] sm:$0xff] %v2843_v61  ;;  %3705 = vst [vmem:[#allocation45_spill] sm:$0xff] %v2846_v1 }
  0xf1   :  { %v208_v62 = vpop.f32.mrf.mxu0  ;;  %v321_v60 = vpop.f32.mrf.mxu1 }
  0xf2   :  { %v2848_v63 = vadd.f32 %v208_v62, %v70_v7  ;;  %v2851_v36 = vadd.f32 %v321_v60, %v2804_v11 }
  0xf3   :  { %v210_v54 = vpop.f32.mrf.mxu0  ;;  %v323_v9 = vpop.f32.mrf.mxu1 }
  0xf4   :  { %3706 = vst [vmem:[#allocation46_spill] sm:$0xff] %v2848_v63  ;;  %3707 = vst [vmem:[#allocation47_spill] sm:$0xff] %v2851_v36  ;;  %v2853_v27 = vadd.f32 %v210_v54, %v74_v5  ;;  %v2856_v0 = vadd.f32 %v323_v9, %v2806_v4 }
  0xf6   :  { %3708 = vst [vmem:[#allocation48_spill] sm:$0xff] %v2853_v27  ;;  %3709 = vst [vmem:[#allocation49_spill] sm:$0xff] %v2856_v0 }
  0xf7   :  { %v214_v10 = vpop.f32.mrf.mxu0  ;;  %v327_v6 = vpop.f32.mrf.mxu1 }
  0xf8   :  { %v2858_v61 = vadd.f32 %v214_v10, %v70_v7  ;;  %v2861_v2 = vadd.f32 %v327_v6, %v2804_v11 }
  0xf9   :  { %v216_v1 = vpop.f32.mrf.mxu0  ;;  %v329_v62 = vpop.f32.mrf.mxu1 }
  0xfa   :  { %3710 = vst [vmem:[#allocation50_spill] sm:$0xff] %v2858_v61  ;;  %3711 = vst [vmem:[#allocation51_spill] sm:$0xff] %v2861_v2  ;;  %v2863_v63 = vadd.f32 %v216_v1, %v74_v5  ;;  %v2866_v60 = vadd.f32 %v329_v62, %v2806_v4  ;;  %v179_v1 = vadd.f32 %v2793_v18, %v70_v7 }
  0xfb   :  { %v181_v62 = vadd.f32 %v2800_v59, %v74_v5 }
  0xfc   :  { %3712 = vst [vmem:[#allocation52_spill] sm:$0xff] %v2863_v63  ;;  %3713 = vst [vmem:[#allocation53_spill] sm:$0xff] %v2866_v60 }
  0xfd   :  { %v220_v36 = vpop.f32.mrf.mxu0  ;;  %v333_v54 = vpop.f32.mrf.mxu1 }
  0xfe   :  { %v2868_v27 = vadd.f32 %v220_v36, %v70_v7  ;;  %v2871_v9 = vadd.f32 %v333_v54, %v2804_v11 }
  0xff   :  { %v222_v0 = vpop.f32.mrf.mxu0  ;;  %v335_v10 = vpop.f32.mrf.mxu1 }
 0x100   :  { %3714 = vst [vmem:[#allocation54_spill] sm:$0xff] %v2868_v27  ;;  %3715 = vst [vmem:[#allocation55_spill] sm:$0xff] %v2871_v9  ;;  %v2873_v61 = vadd.f32 %v222_v0, %v74_v5  ;;  %v2876_v6 = vadd.f32 %v335_v10, %v2806_v4  ;;  %v294_v0 = vadd.f32 %v2802_v8, %v2806_v4 }
 0x101   :  { %v292_v10 = vadd.f32 %v2795_v45, %v2804_v11 }
 0x102   :  { %3716 = vst [vmem:[#allocation56_spill] sm:$0xff] %v2873_v61  ;;  %3717 = vst [vmem:[#allocation57_spill] sm:$0xff] %v2876_v6 }
 0x103   :  { %v509_v2 = vpop.f32.mrf.mxu0  ;;  %v580_v27 = vpop.f32.mrf.mxu1 }
 0x104   :  { %v585_v60 = vadd.f32 %v509_v2, %v179_v1  ;;  %v587_v6 = vadd.f32 %v580_v27, %v292_v10  ;;  %v3718_v27 = vld [vmem:[#allocation10_spill] sm:$0xff]  ;;  %v3723_v10 = vld [vmem:[#allocation15_spill] sm:$0xff] }
 0x105   :  { %v511_v63 = vpop.f32.mrf.mxu0  ;;  %v582_v9 = vpop.f32.mrf.mxu1 }
 0x106   :  { %v2070_v3 = vmul.f32 -1.442695, %v585_v60  ;;  %v586_v36 = vadd.f32 %v511_v63, %v181_v62  ;;  %v588_v61 = vadd.f32 %v582_v9, %v294_v0  ;;  %v3722_v0 = vld [vmem:[#allocation14_spill] sm:$0xff] }
 0x108   :  { %2182 = vpow2.f32 %v2070_v3  ;;  %v2071_v54 = vmul.f32 -1.442695, %v586_v36  ;;  %v2072_v7 = vmul.f32 -1.442695, %v588_v61  ;;  %v3720_v36 = vld [vmem:[#allocation12_spill] sm:$0xff] }
 0x10a   :  { %2184 = vpow2.f32 %v2071_v54  ;;  %v3721_v54 = vld [vmem:[#allocation13_spill] sm:$0xff] }
 0x10b   :  { %2186 = vpow2.f32 %v2072_v7  ;;  %v3724_v7 = vld [vmem:[#allocation16_spill] sm:$0xff] }
 0x115   :  { %v2183_v18 = vpop.eup %2182 }
 0x116   :  { %v592_v59 = vadd.f32 1.0, %v2183_v18  ;;  %v3725_v18 = vld [vmem:[#allocation17_spill] sm:$0xff] }
 0x117   :  { %v2185_v5 = vpop.eup %2184 }
 0x118   :  { %2188 = vrcp.f32 %v592_v59  ;;  %v598_v63 = vadd.f32 1.0, %v2185_v5  ;;  %v2187_v3 = vpop.eup %2186  ;;  %v3726_v59 = vld [vmem:[#allocation18_spill] sm:$0xff]  ;;  %v3727_v5 = vld [vmem:[#allocation19_spill] sm:$0xff] }
 0x119   :  { %2190 = vtanh.f32 %v587_v6  ;;  %v605_v62 = vadd.f32 1.0, %v2187_v3  ;;  %v3719_v6 = vld [vmem:[#allocation11_spill] sm:$0xff]  ;;  %v3729_v3 = vld [vmem:[#allocation21_spill] sm:$0xff] }
 0x11a   :  { %2192 = vrcp.f32 %v598_v63  ;;  %v3728_v63 = vld [vmem:[#allocation20_spill] sm:$0xff] }
 0x11b   :  { %2194 = vrcp.f32 %v605_v62  ;;  %v3733_v62 = vld [vmem:[#allocation25_spill] sm:$0xff] }
 0x125   :  { %v2189_v2 = vpop.eup %2188 }
 0x126   :  { %v2191_v60 = vpop.eup %2190 }
 0x127   :  { %v2193_v1 = vpop.eup %2192  ;;  %v609_v8 = vmul.f32 %v2191_v60, %v2189_v2  ;;  %v3730_v2 = vld [vmem:[#allocation22_spill] sm:$0xff]  ;;  %v3731_v60 = vld [vmem:[#allocation23_spill] sm:$0xff] }
 0x128   :  { %v608_v4 = vmul.f32 0.0, %v2193_v1  ;;  %v2195_v11 = vpop.eup %2194  ;;  %v3732_v1 = vld [vmem:[#allocation24_spill] sm:$0xff] }
 0x12a   :  { %v2884_v9 = vadd.f32 %v609_v8, %v608_v4  ;;  %v3734_v4 = vld [vmem:[#allocation26_spill] sm:$0xff]  ;;  %v3735_v8 = vld [vmem:[#allocation27_spill] sm:$0xff] }
 0x12c   :  { %2196 = vtanh.f32 %v2884_v9 }
 0x139   :  { %v2197_v61 = vpop.eup %2196 }
 0x13a   :  { %v612_v45 = vmul.f32 %v2197_v61, %v2195_v11  ;;  %v3736_v11 = vld [vmem:[#allocation28_spill] sm:$0xff]  ;;  %v3737_v61 = vmov 0.0  }
 0x13c   :  { %685 = vmatmul.mubr.f32.vlgmr.msra.gmra.mxu0 %v612_v45  ;;  %756 = vmatmul.mubr.f32.vlgmr.msra.gmra.mxu1 %v612_v45  ;;  %v3738_v45 = vld [vmem:[#allocation29_spill] sm:$0xff] }
 0x13d   :  { %798 = vmatpush1.msra.mxu0 %v2482_v12  ;;  %869 = vmatpush1.msra.mxu1 %v2484_v13 }
 0x13e   :  { %799 = vmatprep.subr.mxu0 %v2488_v14  ;;  %870 = vmatprep.subr.mxu1 %v2490_v15 }
 0x13f   :  { %800 = vmatpush1.msra.mxu0 %v2496_v16  ;;  %871 = vmatpush1.msra.mxu1 %v2498_v17 }
 0x140   :  { %801 = vmatprep.subr.mxu0 %v2507_v19  ;;  %872 = vmatprep.subr.mxu1 %v2509_v20 }
 0x141   :  { %802 = vmatpush1.msra.mxu0 %v2513_v21  ;;  %873 = vmatpush1.msra.mxu1 %v2515_v22 }
 0x142   :  { %803 = vmatprep.subr.mxu0 %v2519_v23  ;;  %874 = vmatprep.subr.mxu1 %v2521_v24 }
 0x143   :  { %804 = vmatpush1.msra.mxu0 %v2527_v25  ;;  %875 = vmatpush1.msra.mxu1 %v2529_v26 }
 0x144   :  { %805 = vmatprep.subr.mxu0 %v2538_v28  ;;  %876 = vmatprep.subr.mxu1 %v2540_v29 }
 0x145   :  { %806 = vmatpush1.msra.mxu0 %v2544_v30  ;;  %877 = vmatpush1.msra.mxu1 %v2546_v31 }
 0x146   :  { %807 = vmatprep.subr.mxu0 %v2550_v32  ;;  %878 = vmatprep.subr.mxu1 %v2552_v33 }
 0x147   :  { %808 = vmatpush1.msra.mxu0 %v2558_v34  ;;  %879 = vmatpush1.msra.mxu1 %v2560_v35 }
 0x148   :  { %809 = vmatprep.subr.mxu0 %v2569_v37  ;;  %880 = vmatprep.subr.mxu1 %v2571_v38 }
 0x149   :  { %810 = vmatpush1.msra.mxu0 %v2575_v39  ;;  %881 = vmatpush1.msra.mxu1 %v2577_v40 }
 0x14a   :  { %811 = vmatprep.subr.mxu0 %v2581_v41  ;;  %882 = vmatprep.subr.mxu1 %v2583_v42 }
 0x14b   :  { %812 = vmatpush1.msra.mxu0 %v2589_v43  ;;  %883 = vmatpush1.msra.mxu1 %v2591_v44 }
 0x14c   :  { %813 = vmatprep.subr.mxu0 %v2600_v46  ;;  %884 = vmatprep.subr.mxu1 %v2602_v47 }
 0x14d   :  { %814 = vmatpush1.msra.mxu0 %v2606_v48  ;;  %885 = vmatpush1.msra.mxu1 %v2608_v49 }
 0x14e   :  { %815 = vmatprep.subr.mxu0 %v2612_v50  ;;  %886 = vmatprep.subr.mxu1 %v2614_v51 }
 0x14f   :  { %816 = vmatpush1.msra.mxu0 %v2620_v52  ;;  %887 = vmatpush1.msra.mxu1 %v2622_v53 }
 0x150   :  { %817 = vmatprep.subr.mxu0 %v2631_v55  ;;  %888 = vmatprep.subr.mxu1 %v2633_v56 }
 0x151   :  { %818 = vmatpush1.msra.mxu0 %v2637_v57  ;;  %889 = vmatpush1.msra.mxu1 %v2639_v58 }
 0x152   :  { %819 = vmatprep.subr.mxu0 %v3718_v27  ;;  %890 = vmatprep.subr.mxu1 %v3719_v6 }
 0x153   :  { %820 = vmatpush1.msra.mxu0 %v3720_v36  ;;  %891 = vmatpush1.msra.mxu1 %v3721_v54 }
 0x154   :  { %821 = vmatprep.subr.mxu0 %v3722_v0  ;;  %892 = vmatprep.subr.mxu1 %v3723_v10  ;;  %v3744_v10 = vld [vmem:[#allocation31_spill] sm:$0xff] }
 0x155   :  { %822 = vmatpush1.msra.mxu0 %v3724_v7  ;;  %893 = vmatpush1.msra.mxu1 %v3725_v18  ;;  %v3743_v7 = vld [vmem:[#allocation33_spill] sm:$0xff] }
 0x156   :  { %823 = vmatprep.subr.mxu0 %v3726_v59  ;;  %894 = vmatprep.subr.mxu1 %v3727_v5 }
 0x157   :  { %824 = vmatpush1.msra.mxu0 %v3728_v63  ;;  %895 = vmatpush1.msra.mxu1 %v3729_v3  ;;  %v3739_v3 = vld [vmem:[#allocation8_spill] sm:$0xff] }
 0x158   :  { %825 = vmatprep.subr.mxu0 %v3730_v2  ;;  %896 = vmatprep.subr.mxu1 %v3731_v60  ;;  %v3740_v2 = vld [vmem:[#allocation9_spill] sm:$0xff] }
 0x159   :  { %826 = vmatpush1.msra.mxu0 %v3732_v1  ;;  %897 = vmatpush1.msra.mxu1 %v3733_v62  ;;  %v3741_v1 = vld [vmem:[#allocation30_spill] sm:$0xff] }
 0x15a   :  { %827 = vmatprep.subr.mxu0 %v3734_v4  ;;  %898 = vmatprep.subr.mxu1 %v3735_v8  ;;  %v3742_v4 = vld [vmem:[#allocation32_spill] sm:$0xff] }
 0x15b   :  { %828 = vmatpush1.msra.mxu0 %v3736_v11  ;;  %861 = vmatprep.mubr.f32.mxu0 %v3737_v61 }
 0x15c   :  { %899 = vmatpush1.msra.mxu1 %v3738_v45  ;;  %932 = vmatprep.mubr.f32.mxu1 %v3737_v61 }
 0x15d   :  { %974 = vmatprep.subr.mxu0 %v3739_v3  ;;  %1045 = vmatprep.subr.mxu1 %v3740_v2 }
 0x1fc   :  { %v686_v60 = vpop.f32.mrf.mxu0  ;;  %v757_v8 = vpop.f32.mrf.mxu1 }
 0x1fd   :  { %v762_v63 = vadd.f32 %v686_v60, %v3741_v1  ;;  %v764_v61 = vadd.f32 %v757_v8, %v3744_v10 }
 0x1fe   :  { %v688_v62 = vpop.f32.mrf.mxu0  ;;  %v759_v18 = vpop.f32.mrf.mxu1 }
 0x1ff   :  { %v2073_v5 = vmul.f32 -1.442695, %v762_v63  ;;  %v763_v59 = vadd.f32 %v688_v62, %v3742_v4  ;;  %v765_v45 = vadd.f32 %v759_v18, %v3743_v7 }
 0x201   :  { %2198 = vpow2.f32 %v2073_v5  ;;  %v2074_v11 = vmul.f32 -1.442695, %v763_v59  ;;  %v2075_v0 = vmul.f32 -1.442695, %v765_v45 }
 0x203   :  { %2200 = vpow2.f32 %v2074_v11 }
 0x204   :  { %2202 = vtanh.f32 %v764_v61 }
 0x205   :  { %2204 = vpow2.f32 %v2075_v0 }
 0x20e   :  { %v2199_v3 = vpop.eup %2198 }
 0x20f   :  { %v769_v54 = vadd.f32 1.0, %v2199_v3 }
 0x210   :  { %v2201_v2 = vpop.eup %2200 }
 0x211   :  { %2206 = vrcp.f32 %v769_v54  ;;  %v775_v60 = vadd.f32 1.0, %v2201_v2  ;;  %v2203_v63 = vpop.eup %2202  ;;  %v3766_v54 = vld [vmem:[#allocation36_spill] sm:$0xff]  ;;  %v3767_v2 = vld [vmem:[#allocation37_spill] sm:$0xff] }
 0x212   :  { %v2205_v1 = vpop.eup %2204 }
 0x213   :  { %2208 = vrcp.f32 %v775_v60  ;;  %v782_v4 = vadd.f32 1.0, %v2205_v1 }
 0x215   :  { %2210 = vrcp.f32 %v782_v4 }
 0x21e   :  { %v2207_v5 = vpop.eup %2206 }
 0x21f   :  { %v786_v62 = vmul.f32 %v2207_v5, %v2203_v63  ;;  %v3768_v63 = vld [vmem:[#allocation35_spill] sm:$0xff] }
 0x220   :  { %v2209_v59 = vpop.eup %2208 }
 0x221   :  { %v785_v11 = vmul.f32 %v2209_v59, %v2884_v9 }
 0x222   :  { %v2211_v10 = vpop.eup %2210 }
 0x223   :  { %v2958_v7 = vadd.f32 %v786_v62, %v785_v11 }
 0x225   :  { %2212 = vtanh.f32 %v2958_v7 }
 0x232   :  { %v2213_v18 = vpop.eup %2212 }
 0x233   :  { %v789_v8 = vmul.f32 %v2213_v18, %v2211_v10 }
 0x235   :  { %862 = vmatmul.mubr.f32.vlgmr.msra.gmra.mxu0 %v789_v8  ;;  %933 = vmatmul.mubr.f32.vlgmr.msra.gmra.mxu1 %v789_v8 }
 0x236   :  { %975 = vmatpush1.msra.mxu0 %v2482_v12  ;;  %1046 = vmatpush1.msra.mxu1 %v2484_v13  ;;  %v3745_v12 = vld [vmem:[#allocation13_spill] sm:$0xff]  ;;  %v3746_v13 = vld [vmem:[#allocation14_spill] sm:$0xff] }
 0x237   :  { %976 = vmatprep.subr.mxu0 %v2488_v14  ;;  %1047 = vmatprep.subr.mxu1 %v2490_v15  ;;  %v3747_v14 = vld [vmem:[#allocation15_spill] sm:$0xff]  ;;  %v3748_v15 = vld [vmem:[#allocation16_spill] sm:$0xff] }
 0x238   :  { %977 = vmatpush1.msra.mxu0 %v2496_v16  ;;  %1048 = vmatpush1.msra.mxu1 %v2498_v17  ;;  %v3749_v16 = vld [vmem:[#allocation17_spill] sm:$0xff]  ;;  %v3750_v17 = vld [vmem:[#allocation18_spill] sm:$0xff] }
 0x239   :  { %978 = vmatprep.subr.mxu0 %v2507_v19  ;;  %1049 = vmatprep.subr.mxu1 %v2509_v20  ;;  %v3751_v19 = vld [vmem:[#allocation19_spill] sm:$0xff]  ;;  %v3752_v20 = vld [vmem:[#allocation20_spill] sm:$0xff] }
 0x23a   :  { %979 = vmatpush1.msra.mxu0 %v2513_v21  ;;  %1050 = vmatpush1.msra.mxu1 %v2515_v22  ;;  %v3753_v21 = vld [vmem:[#allocation21_spill] sm:$0xff]  ;;  %v3754_v22 = vld [vmem:[#allocation22_spill] sm:$0xff] }
 0x23b   :  { %980 = vmatprep.subr.mxu0 %v2519_v23  ;;  %1051 = vmatprep.subr.mxu1 %v2521_v24  ;;  %v3755_v23 = vld [vmem:[#allocation23_spill] sm:$0xff]  ;;  %v3756_v24 = vld [vmem:[#allocation24_spill] sm:$0xff] }
 0x23c   :  { %981 = vmatpush1.msra.mxu0 %v2527_v25  ;;  %1052 = vmatpush1.msra.mxu1 %v2529_v26  ;;  %v3757_v25 = vld [vmem:[#allocation25_spill] sm:$0xff]  ;;  %v3758_v26 = vld [vmem:[#allocation26_spill] sm:$0xff] }
 0x23d   :  { %982 = vmatprep.subr.mxu0 %v2538_v28  ;;  %1053 = vmatprep.subr.mxu1 %v2540_v29  ;;  %v3759_v28 = vld [vmem:[#allocation27_spill] sm:$0xff]  ;;  %v3760_v29 = vld [vmem:[#allocation28_spill] sm:$0xff] }
 0x23e   :  { %983 = vmatpush1.msra.mxu0 %v2544_v30  ;;  %1054 = vmatpush1.msra.mxu1 %v2546_v31  ;;  %v3761_v30 = vmov 0.0   ;;  %v3762_v31 = vld [vmem:[#allocation29_spill] sm:$0xff] }
 0x23f   :  { %984 = vmatprep.subr.mxu0 %v2550_v32  ;;  %1055 = vmatprep.subr.mxu1 %v2552_v33  ;;  %v3025_v32 = vld [vmem:[#allocation5 + $0x1e8] sm:$0xff]  ;;  %v3028_v33 = vld [vmem:[#allocation5 + $0x1f8] sm:$0xff] }
 0x240   :  { %985 = vmatpush1.msra.mxu0 %v2558_v34  ;;  %1056 = vmatpush1.msra.mxu1 %v2560_v35  ;;  %3763 = vst [vmem:[#allocation10_spill] sm:$0xff] %v3025_v32  ;;  %3764 = vst [vmem:[#allocation11_spill] sm:$0xff] %v3028_v33  ;;  %v3765_v35 = vld [vmem:[#allocation34_spill] sm:$0xff] }
 0x241   :  { %986 = vmatprep.subr.mxu0 %v2569_v37  ;;  %1057 = vmatprep.subr.mxu1 %v2571_v38 }
 0x242   :  { %987 = vmatpush1.msra.mxu0 %v2575_v39  ;;  %1058 = vmatpush1.msra.mxu1 %v2577_v40 }
 0x243   :  { %988 = vmatprep.subr.mxu0 %v2581_v41  ;;  %1059 = vmatprep.subr.mxu1 %v2583_v42 }
 0x244   :  { %989 = vmatpush1.msra.mxu0 %v2589_v43  ;;  %1060 = vmatpush1.msra.mxu1 %v2591_v44 }
 0x245   :  { %990 = vmatprep.subr.mxu0 %v2600_v46  ;;  %1061 = vmatprep.subr.mxu1 %v2602_v47 }
 0x246   :  { %991 = vmatpush1.msra.mxu0 %v2606_v48  ;;  %1062 = vmatpush1.msra.mxu1 %v2608_v49 }
 0x247   :  { %992 = vmatprep.subr.mxu0 %v2612_v50  ;;  %1063 = vmatprep.subr.mxu1 %v2614_v51 }
 0x248   :  { %993 = vmatpush1.msra.mxu0 %v2620_v52  ;;  %1064 = vmatpush1.msra.mxu1 %v2622_v53 }
 0x249   :  { %994 = vmatprep.subr.mxu0 %v2631_v55  ;;  %1065 = vmatprep.subr.mxu1 %v2633_v56 }
 0x24a   :  { %995 = vmatpush1.msra.mxu0 %v2637_v57  ;;  %1066 = vmatpush1.msra.mxu1 %v2639_v58 }
 0x24b   :  { %996 = vmatprep.subr.mxu0 %v3718_v27  ;;  %1067 = vmatprep.subr.mxu1 %v3719_v6 }
 0x24c   :  { %997 = vmatpush1.msra.mxu0 %v3720_v36  ;;  %1068 = vmatpush1.msra.mxu1 %v3745_v12 }
 0x24d   :  { %998 = vmatprep.subr.mxu0 %v3746_v13  ;;  %1069 = vmatprep.subr.mxu1 %v3747_v14 }
 0x24e   :  { %999 = vmatpush1.msra.mxu0 %v3748_v15  ;;  %1070 = vmatpush1.msra.mxu1 %v3749_v16 }
 0x24f   :  { %1000 = vmatprep.subr.mxu0 %v3750_v17  ;;  %1071 = vmatprep.subr.mxu1 %v3751_v19 }
 0x250   :  { %1001 = vmatpush1.msra.mxu0 %v3752_v20  ;;  %1072 = vmatpush1.msra.mxu1 %v3753_v21 }
 0x251   :  { %1002 = vmatprep.subr.mxu0 %v3754_v22  ;;  %1073 = vmatprep.subr.mxu1 %v3755_v23 }
 0x252   :  { %1003 = vmatpush1.msra.mxu0 %v3756_v24  ;;  %1074 = vmatpush1.msra.mxu1 %v3757_v25 }
 0x253   :  { %1004 = vmatprep.subr.mxu0 %v3758_v26  ;;  %1075 = vmatprep.subr.mxu1 %v3759_v28 }
 0x254   :  { %1005 = vmatpush1.msra.mxu0 %v3760_v29  ;;  %1038 = vmatprep.mubr.f32.mxu0 %v3761_v30 }
 0x255   :  { %1076 = vmatpush1.msra.mxu1 %v3762_v31  ;;  %1109 = vmatprep.mubr.f32.mxu1 %v3761_v30 }
 0x256   :  { %1151 = vmatprep.subr.mxu0 %v3025_v32  ;;  %1222 = vmatprep.subr.mxu1 %v3028_v33 }
 0x2f5   :  { %v863_v34 = vpop.f32.mrf.mxu0  ;;  %v934_v61 = vpop.f32.mrf.mxu1 }
 0x2f6   :  { %v939_v37 = vadd.f32 %v863_v34, %v3765_v35  ;;  %v941_v1 = vadd.f32 %v934_v61, %v3768_v63  ;;  %v3054_v63 = vld [vmem:[#allocation5 + $0x1d0] sm:$0xff] }
 0x2f7   :  { %v865_v38 = vpop.f32.mrf.mxu0  ;;  %v936_v3 = vpop.f32.mrf.mxu1 }
 0x2f8   :  { %v2076_v9 = vmul.f32 -1.442695, %v939_v37  ;;  %v940_v0 = vadd.f32 %v865_v38, %v3766_v54  ;;  %v942_v60 = vadd.f32 %v936_v3, %v3767_v2  ;;  %v3042_v3 = vld [vmem:[#allocation5 + $0x1f0] sm:$0xff]  ;;  %v3045_v2 = vld [vmem:[#allocation5 + $0x1c8] sm:$0xff] }
 0x2fa   :  { %2214 = vpow2.f32 %v2076_v9  ;;  %v2077_v45 = vmul.f32 -1.442695, %v940_v0  ;;  %v2078_v5 = vmul.f32 -1.442695, %v942_v60  ;;  %v3051_v60 = vld [vmem:[#allocation5 + $0x1c0] sm:$0xff] }
 0x2fc   :  { %2216 = vpow2.f32 %v2077_v45  ;;  %v3039_v45 = vld [vmem:[#allocation5 + $0x1e0] sm:$0xff] }
 0x2fd   :  { %2218 = vtanh.f32 %v941_v1  ;;  %v3057_v1 = vld [vmem:[#allocation5 + $0x1a8] sm:$0xff] }
 0x2fe   :  { %2220 = vpow2.f32 %v2078_v5  ;;  %v3060_v5 = vld [vmem:[#allocation5 + $0x1b8] sm:$0xff] }
 0x307   :  { %v2215_v62 = vpop.eup %2214 }
 0x308   :  { %v946_v59 = vadd.f32 1.0, %v2215_v62  ;;  %v3063_v62 = vld [vmem:[#allocation5 + $0x1a0] sm:$0xff] }
 0x309   :  { %v2217_v4 = vpop.eup %2216 }
 0x30a   :  { %2222 = vrcp.f32 %v946_v59  ;;  %v952_v11 = vadd.f32 1.0, %v2217_v4  ;;  %v2219_v10 = vpop.eup %2218  ;;  %v3066_v59 = vld [vmem:[#allocation5 + $0x1b0] sm:$0xff]  ;;  %v3069_v4 = vld [vmem:[#allocation5 + $0x188] sm:$0xff] }
 0x30b   :  { %v2221_v18 = vpop.eup %2220 }
 0x30c   :  { %2224 = vrcp.f32 %v952_v11  ;;  %v959_v37 = vadd.f32 1.0, %v2221_v18  ;;  %v3072_v11 = vld [vmem:[#allocation5 + $0x198] sm:$0xff]  ;;  %v3078_v18 = vld [vmem:[#allocation5 + $0x190] sm:$0xff] }
 0x30e   :  { %2226 = vrcp.f32 %v959_v37  ;;  %v3090_v37 = vld [vmem:[#allocation5 + $0x170] sm:$0xff] }
 0x30f   :  { %3770 = vst [vmem:[#allocation8_spill] sm:$0xff] %v3090_v37 }
 0x317   :  { %v2223_v8 = vpop.eup %2222 }
 0x318   :  { %v963_v34 = vmul.f32 %v2223_v8, %v2219_v10  ;;  %v3075_v10 = vld [vmem:[#allocation5 + $0x180] sm:$0xff]  ;;  %v3081_v8 = vld [vmem:[#allocation5 + $0x168] sm:$0xff] }
 0x319   :  { %v2225_v35 = vpop.eup %2224 }
 0x31a   :  { %v962_v38 = vmul.f32 %v2225_v35, %v2958_v7  ;;  %v3048_v7 = vld [vmem:[#allocation5 + $0x1d8] sm:$0xff]  ;;  %v3087_v35 = vld [vmem:[#allocation5 + $0x160] sm:$0xff] }
 0x31b   :  { %v2227_v54 = vpop.eup %2226  ;;  %3769 = vst [vmem:[#allocation12_spill] sm:$0xff] %v3087_v35 }
 0x31c   :  { %v3036_v9 = vadd.f32 %v963_v34, %v962_v38  ;;  %v3084_v34 = vld [vmem:[#allocation5 + $0x178] sm:$0xff]  ;;  %v3093_v38 = vld [vmem:[#allocation5 + $0x148] sm:$0xff] }
 0x31e   :  { %2228 = vtanh.f32 %v3036_v9 }
 0x32b   :  { %v2229_v0 = vpop.eup %2228 }
 0x32c   :  { %v966_v61 = vmul.f32 %v2229_v0, %v2227_v54  ;;  %v3096_v54 = vld [vmem:[#allocation5 + $0x158] sm:$0xff]  ;;  %v3099_v0 = vld [vmem:[#allocation5 + $0x140] sm:$0xff] }
 0x32e   :  { %1039 = vmatmul.mubr.f32.vlgmr.msra.gmra.mxu0 %v966_v61  ;;  %1110 = vmatmul.mubr.f32.vlgmr.msra.gmra.mxu1 %v966_v61  ;;  %v3102_v61 = vld [vmem:[#allocation5 + $0x150] sm:$0xff] }
 0x32f   :  { %1152 = vmatpush1.msra.mxu0 %v3039_v45  ;;  %1223 = vmatpush1.msra.mxu1 %v3042_v3 }
 0x330   :  { %1153 = vmatprep.subr.mxu0 %v3045_v2  ;;  %1224 = vmatprep.subr.mxu1 %v3048_v7 }
 0x331   :  { %1154 = vmatpush1.msra.mxu0 %v3051_v60  ;;  %1225 = vmatpush1.msra.mxu1 %v3054_v63 }
 0x332   :  { %1155 = vmatprep.subr.mxu0 %v3057_v1  ;;  %1226 = vmatprep.subr.mxu1 %v3060_v5 }
 0x333   :  { %1156 = vmatpush1.msra.mxu0 %v3063_v62  ;;  %1227 = vmatpush1.msra.mxu1 %v3066_v59 }
 0x334   :  { %1157 = vmatprep.subr.mxu0 %v3069_v4  ;;  %1228 = vmatprep.subr.mxu1 %v3072_v11 }
 0x335   :  { %1158 = vmatpush1.msra.mxu0 %v3075_v10  ;;  %1229 = vmatpush1.msra.mxu1 %v3078_v18 }
 0x336   :  { %1159 = vmatprep.subr.mxu0 %v3081_v8  ;;  %1230 = vmatprep.subr.mxu1 %v3084_v34 }
 0x337   :  { %1160 = vmatpush1.msra.mxu0 %v3087_v35  ;;  %1231 = vmatpush1.msra.mxu1 %v3090_v37  ;;  %v3105_v35 = vld [vmem:[#allocation5 + $0x128] sm:$0xff]  ;;  %v3108_v37 = vld [vmem:[#allocation5 + $0x138] sm:$0xff] }
 0x338   :  { %1161 = vmatprep.subr.mxu0 %v3093_v38  ;;  %1232 = vmatprep.subr.mxu1 %v3096_v54 }
 0x339   :  { %1162 = vmatpush1.msra.mxu0 %v3099_v0  ;;  %1233 = vmatpush1.msra.mxu1 %v3102_v61 }
 0x33a   :  { %1163 = vmatprep.subr.mxu0 %v3105_v35  ;;  %1234 = vmatprep.subr.mxu1 %v3108_v37 }
 0x33b   :  { %1164 = vmatpush1.msra.mxu0 %v2575_v39  ;;  %1235 = vmatpush1.msra.mxu1 %v2577_v40  ;;  %v3771_v40 = vld [vmem:[#allocation38_spill] sm:$0xff] }
 0x33c   :  { %1165 = vmatprep.subr.mxu0 %v2581_v41  ;;  %1236 = vmatprep.subr.mxu1 %v2583_v42 }
 0x33d   :  { %1166 = vmatpush1.msra.mxu0 %v2589_v43  ;;  %1237 = vmatpush1.msra.mxu1 %v2591_v44  ;;  %v3772_v44 = vld [vmem:[#allocation40_spill] sm:$0xff] }
 0x33e   :  { %1167 = vmatprep.subr.mxu0 %v2600_v46  ;;  %1238 = vmatprep.subr.mxu1 %v2602_v47 }
 0x33f   :  { %1168 = vmatpush1.msra.mxu0 %v2606_v48  ;;  %1239 = vmatpush1.msra.mxu1 %v2608_v49 }
 0x340   :  { %1169 = vmatprep.subr.mxu0 %v2612_v50  ;;  %1240 = vmatprep.subr.mxu1 %v2614_v51  ;;  %v3773_v50 = vld [vmem:[#allocation41_spill] sm:$0xff] }
 0x341   :  { %1170 = vmatpush1.msra.mxu0 %v2620_v52  ;;  %1241 = vmatpush1.msra.mxu1 %v2622_v53  ;;  %v3774_v52 = vld [vmem:[#allocation39_spill] sm:$0xff] }
 0x342   :  { %1171 = vmatprep.subr.mxu0 %v2631_v55  ;;  %1242 = vmatprep.subr.mxu1 %v2633_v56 }
 0x343   :  { %1172 = vmatpush1.msra.mxu0 %v2637_v57  ;;  %1243 = vmatpush1.msra.mxu1 %v2639_v58 }
 0x344   :  { %1173 = vmatprep.subr.mxu0 %v3718_v27  ;;  %1244 = vmatprep.subr.mxu1 %v3719_v6 }
 0x345   :  { %1174 = vmatpush1.msra.mxu0 %v3720_v36  ;;  %1245 = vmatpush1.msra.mxu1 %v3745_v12 }
 0x346   :  { %1175 = vmatprep.subr.mxu0 %v3746_v13  ;;  %1246 = vmatprep.subr.mxu1 %v3747_v14 }
 0x347   :  { %1176 = vmatpush1.msra.mxu0 %v3748_v15  ;;  %1247 = vmatpush1.msra.mxu1 %v3749_v16 }
 0x348   :  { %1177 = vmatprep.subr.mxu0 %v3750_v17  ;;  %1248 = vmatprep.subr.mxu1 %v3751_v19 }
 0x349   :  { %1178 = vmatpush1.msra.mxu0 %v3752_v20  ;;  %1249 = vmatpush1.msra.mxu1 %v3753_v21 }
 0x34a   :  { %1179 = vmatprep.subr.mxu0 %v3754_v22  ;;  %1250 = vmatprep.subr.mxu1 %v3755_v23  ;;  %v3775_v22 = vld [vmem:[#allocation12_spill] sm:$0xff] }
 0x34b   :  { %1180 = vmatpush1.msra.mxu0 %v3756_v24  ;;  %1251 = vmatpush1.msra.mxu1 %v3757_v25  ;;  %v3776_v23 = vld [vmem:[#allocation8_spill] sm:$0xff]  ;;  %v3188_v25 = vld [vmem:[#allocation5 + $0x130] sm:$0xff] }
 0x34c   :  { %1181 = vmatprep.subr.mxu0 %v3758_v26  ;;  %1252 = vmatprep.subr.mxu1 %v3759_v28  ;;  %v3185_v24 = vld [vmem:[#allocation5 + $0x120] sm:$0xff]  ;;  %v3191_v26 = vld [vmem:[#allocation5 + $0x108] sm:$0xff]  ;;  %v3194_v28 = vld [vmem:[#allocation5 + $0x118] sm:$0xff] }
 0x34d   :  { %1182 = vmatpush1.msra.mxu0 %v3760_v29  ;;  %1215 = vmatprep.mubr.f32.mxu0 %v3761_v30  ;;  %v3197_v29 = vld [vmem:[#allocation5 + $0x100] sm:$0xff] }
 0x34e   :  { %1253 = vmatpush1.msra.mxu1 %v3762_v31  ;;  %1286 = vmatprep.mubr.f32.mxu1 %v3761_v30  ;;  %v3200_v31 = vld [vmem:[#allocation5 + $0x110] sm:$0xff] }
 0x34f   :  { %1328 = vmatprep.subr.mxu0 %v3025_v32  ;;  %1399 = vmatprep.subr.mxu1 %v3028_v33 }
 0x3ee   :  { %v1040_v39 = vpop.f32.mrf.mxu0  ;;  %v1111_v47 = vpop.f32.mrf.mxu1 }
 0x3ef   :  { %v1116_v41 = vadd.f32 %v1040_v39, %v3771_v40  ;;  %v1118_v53 = vadd.f32 %v1111_v47, %v3774_v52  ;;  %v3206_v39 = vld [vmem:[#allocation5 + $0xf8] sm:$0xff]  ;;  %v3209_v40 = vld [vmem:[#allocation5 + $0xe0] sm:$0xff]  ;;  %v3227_v47 = vld [vmem:[#allocation5 + $0xa8] sm:$0xff] }
 0x3f0   :  { %v1042_v42 = vpop.f32.mrf.mxu0  ;;  %v1113_v49 = vpop.f32.mrf.mxu1  ;;  %v3242_v52 = vld [vmem:[#allocation5 + $0x98] sm:$0xff] }
 0x3f1   :  { %v2079_v43 = vmul.f32 -1.442695, %v1116_v41  ;;  %v1117_v46 = vadd.f32 %v1042_v42, %v3772_v44  ;;  %v1119_v51 = vadd.f32 %v1113_v49, %v3773_v50  ;;  %v3212_v41 = vld [vmem:[#allocation5 + $0xf0] sm:$0xff]  ;;  %v3215_v42 = vld [vmem:[#allocation5 + $0xc8] sm:$0xff]  ;;  %v3221_v44 = vld [vmem:[#allocation5 + $0xc0] sm:$0xff] }
 0x3f2   :  { %v3233_v49 = vld [vmem:[#allocation5 + $0xa0] sm:$0xff]  ;;  %v3236_v50 = vld [vmem:[#allocation5 + $0xb0] sm:$0xff] }
 0x3f3   :  { %2230 = vpow2.f32 %v2079_v43  ;;  %v2080_v48 = vmul.f32 -1.442695, %v1117_v46  ;;  %v2081_v55 = vmul.f32 -1.442695, %v1119_v51  ;;  %v3218_v43 = vld [vmem:[#allocation5 + $0xd8] sm:$0xff]  ;;  %v3224_v46 = vld [vmem:[#allocation5 + $0xd0] sm:$0xff] }
 0x3f4   :  { %v3239_v51 = vld [vmem:[#allocation5 + $0x88] sm:$0xff] }
 0x3f5   :  { %2232 = vpow2.f32 %v2080_v48  ;;  %v3230_v48 = vld [vmem:[#allocation5 + $0xb8] sm:$0xff] }
 0x3f6   :  { %2234 = vtanh.f32 %v1118_v53  ;;  %v3245_v53 = vld [vmem:[#allocation5 + $0x80] sm:$0xff] }
 0x3f7   :  { %2236 = vpow2.f32 %v2081_v55  ;;  %v3248_v55 = vld [vmem:[#allocation5 + $0x90] sm:$0xff] }
 0x3f8   :  { %3777 = vst [vmem:[#allocation9_spill] sm:$0xff] %v3248_v55 }
 0x400   :  { %v2231_v56 = vpop.eup %2230 }
 0x401   :  { %v1123_v57 = vadd.f32 1.0, %v2231_v56  ;;  %v3251_v56 = vld [vmem:[#allocation5 + $0x68] sm:$0xff] }
 0x402   :  { %v2233_v58 = vpop.eup %2232  ;;  %3778 = vst [vmem:[#allocation30_spill] sm:$0xff] %v3251_v56 }
 0x403   :  { %2238 = vrcp.f32 %v1123_v57  ;;  %v1129_v27 = vadd.f32 1.0, %v2233_v58  ;;  %v2235_v6 = vpop.eup %2234  ;;  %v3254_v57 = vld [vmem:[#allocation5 + $0x78] sm:$0xff]  ;;  %v3257_v58 = vld [vmem:[#allocation5 + $0x60] sm:$0xff] }
 0x404   :  { %v2237_v36 = vpop.eup %2236  ;;  %3779 = vst [vmem:[#allocation32_spill] sm:$0xff] %v3254_v57  ;;  %3780 = vst [vmem:[#allocation33_spill] sm:$0xff] %v3257_v58 }
 0x405   :  { %2240 = vrcp.f32 %v1129_v27  ;;  %v1136_v15 = vadd.f32 1.0, %v2237_v36  ;;  %v3260_v27 = vld [vmem:[#allocation5 + $0x70] sm:$0xff]  ;;  %v3266_v36 = vld [vmem:[#allocation5 + $0x58] sm:$0xff] }
 0x406   :  { %3781 = vst [vmem:[#allocation31_spill] sm:$0xff] %v3260_v27  ;;  %3783 = vst [vmem:[#allocation14_spill] sm:$0xff] %v3266_v36 }
 0x407   :  { %2242 = vrcp.f32 %v1136_v15  ;;  %v3278_v15 = vld [vmem:[#allocation5 + $0x38] sm:$0xff] }
 0x408   :  { %3787 = vst [vmem:[#allocation18_spill] sm:$0xff] %v3278_v15 }
 0x410   :  { %v2239_v12 = vpop.eup %2238 }
 0x411   :  { %v1140_v13 = vmul.f32 %v2239_v12, %v2235_v6  ;;  %v3263_v6 = vld [vmem:[#allocation5 + $0x48] sm:$0xff]  ;;  %v3269_v12 = vld [vmem:[#allocation5 + $0x40] sm:$0xff] }
 0x412   :  { %v2241_v14 = vpop.eup %2240  ;;  %3782 = vst [vmem:[#allocation13_spill] sm:$0xff] %v3263_v6  ;;  %3784 = vst [vmem:[#allocation15_spill] sm:$0xff] %v3269_v12 }
 0x413   :  { %v1139_v16 = vmul.f32 %v2241_v14, %v3036_v9  ;;  %v3203_v9 = vld [vmem:[#allocation5 + $0xe8] sm:$0xff] }
 0x414   :  { %v2243_v19 = vpop.eup %2242  ;;  %v3275_v14 = vld [vmem:[#allocation5 + $0x28] sm:$0xff] }
 0x415   :  { %v3158_v17 = vadd.f32 %v1140_v13, %v1139_v16  ;;  %v3272_v13 = vld [vmem:[#allocation5 + $0x50] sm:$0xff]  ;;  %3786 = vst [vmem:[#allocation17_spill] sm:$0xff] %v3275_v14  ;;  %v3281_v16 = vld [vmem:[#allocation5 + $0x20] sm:$0xff] }
 0x416   :  { %3785 = vst [vmem:[#allocation16_spill] sm:$0xff] %v3272_v13  ;;  %3788 = vst [vmem:[#allocation19_spill] sm:$0xff] %v3281_v16 }
 0x417   :  { %2244 = vtanh.f32 %v3158_v17 }
 0x424   :  { %v2245_v20 = vpop.eup %2244 }
 0x425   :  { %v1143_v21 = vmul.f32 %v2245_v20, %v2243_v19  ;;  %v3284_v19 = vld [vmem:[#allocation5 + $0x30] sm:$0xff]  ;;  %v3287_v20 = vld [vmem:[#allocation5 + $0x8] sm:$0xff] }
 0x426   :  { %3789 = vst [vmem:[#allocation20_spill] sm:$0xff] %v3284_v19  ;;  %3790 = vst [vmem:[#allocation21_spill] sm:$0xff] %v3287_v20 }
 0x427   :  { %1216 = vmatmul.mubr.f32.vlgmr.msra.gmra.mxu0 %v1143_v21  ;;  %1287 = vmatmul.mubr.f32.vlgmr.msra.gmra.mxu1 %v1143_v21  ;;  %v3290_v21 = vld [vmem:[#allocation5 + $0x18] sm:$0xff] }
 0x428   :  { %1329 = vmatpush1.msra.mxu0 %v3039_v45  ;;  %1400 = vmatpush1.msra.mxu1 %v3042_v3  ;;  %3791 = vst [vmem:[#allocation22_spill] sm:$0xff] %v3290_v21 }
 0x429   :  { %1330 = vmatprep.subr.mxu0 %v3045_v2  ;;  %1401 = vmatprep.subr.mxu1 %v3048_v7 }
 0x42a   :  { %1331 = vmatpush1.msra.mxu0 %v3051_v60  ;;  %1402 = vmatpush1.msra.mxu1 %v3054_v63 }
 0x42b   :  { %1332 = vmatprep.subr.mxu0 %v3057_v1  ;;  %1403 = vmatprep.subr.mxu1 %v3060_v5 }
 0x42c   :  { %1333 = vmatpush1.msra.mxu0 %v3063_v62  ;;  %1404 = vmatpush1.msra.mxu1 %v3066_v59 }
 0x42d   :  { %1334 = vmatprep.subr.mxu0 %v3069_v4  ;;  %1405 = vmatprep.subr.mxu1 %v3072_v11 }
 0x42e   :  { %1335 = vmatpush1.msra.mxu0 %v3075_v10  ;;  %1406 = vmatpush1.msra.mxu1 %v3078_v18 }
 0x42f   :  { %1336 = vmatprep.subr.mxu0 %v3081_v8  ;;  %1407 = vmatprep.subr.mxu1 %v3084_v34 }
 0x430   :  { %1337 = vmatpush1.msra.mxu0 %v3775_v22  ;;  %1408 = vmatpush1.msra.mxu1 %v3776_v23 }
 0x431   :  { %1338 = vmatprep.subr.mxu0 %v3093_v38  ;;  %1409 = vmatprep.subr.mxu1 %v3096_v54 }
 0x432   :  { %1339 = vmatpush1.msra.mxu0 %v3099_v0  ;;  %1410 = vmatpush1.msra.mxu1 %v3102_v61 }
 0x433   :  { %1340 = vmatprep.subr.mxu0 %v3105_v35  ;;  %1411 = vmatprep.subr.mxu1 %v3108_v37 }
 0x434   :  { %1341 = vmatpush1.msra.mxu0 %v3185_v24  ;;  %1412 = vmatpush1.msra.mxu1 %v3188_v25 }
 0x435   :  { %1342 = vmatprep.subr.mxu0 %v3191_v26  ;;  %1413 = vmatprep.subr.mxu1 %v3194_v28 }
 0x436   :  { %1343 = vmatpush1.msra.mxu0 %v3197_v29  ;;  %1414 = vmatpush1.msra.mxu1 %v3200_v31 }
 0x437   :  { %1344 = vmatprep.subr.mxu0 %v3203_v9  ;;  %1415 = vmatprep.subr.mxu1 %v3206_v39 }
 0x438   :  { %1345 = vmatpush1.msra.mxu0 %v3209_v40  ;;  %1416 = vmatpush1.msra.mxu1 %v3212_v41 }
 0x439   :  { %1346 = vmatprep.subr.mxu0 %v3215_v42  ;;  %1417 = vmatprep.subr.mxu1 %v3218_v43 }
 0x43a   :  { %1347 = vmatpush1.msra.mxu0 %v3221_v44  ;;  %1418 = vmatpush1.msra.mxu1 %v3224_v46 }
 0x43b   :  { %1348 = vmatprep.subr.mxu0 %v3227_v47  ;;  %1419 = vmatprep.subr.mxu1 %v3230_v48 }
 0x43c   :  { %1349 = vmatpush1.msra.mxu0 %v3233_v49  ;;  %1420 = vmatpush1.msra.mxu1 %v3236_v50 }
 0x43d   :  { %1350 = vmatprep.subr.mxu0 %v3239_v51  ;;  %1421 = vmatprep.subr.mxu1 %v3242_v52 }
 0x43e   :  { %1351 = vmatpush1.msra.mxu0 %v3245_v53  ;;  %1422 = vmatpush1.msra.mxu1 %v3248_v55 }
 0x43f   :  { %1352 = vmatprep.subr.mxu0 %v3251_v56  ;;  %1423 = vmatprep.subr.mxu1 %v3254_v57  ;;  %v3797_v57 = vld [vmem:[#allocation43_spill] sm:$0xff] }
 0x440   :  { %1353 = vmatpush1.msra.mxu0 %v3257_v58  ;;  %1424 = vmatpush1.msra.mxu1 %v3260_v27  ;;  %v3796_v58 = vld [vmem:[#allocation45_spill] sm:$0xff] }
 0x441   :  { %1354 = vmatprep.subr.mxu0 %v3263_v6  ;;  %1425 = vmatprep.subr.mxu1 %v3266_v36 }
 0x442   :  { %1355 = vmatpush1.msra.mxu0 %v3269_v12  ;;  %1426 = vmatpush1.msra.mxu1 %v3272_v13  ;;  %v3795_v12 = vld [vmem:[#allocation44_spill] sm:$0xff] }
 0x443   :  { %1356 = vmatprep.subr.mxu0 %v3275_v14  ;;  %1427 = vmatprep.subr.mxu1 %v3278_v15  ;;  %v3293_v14 = vld [vmem:[#allocation5] sm:$0xff]  ;;  %v3297_v15 = vld [vmem:[#allocation5 + $0x10] sm:$0xff] }
 0x444   :  { %1357 = vmatpush1.msra.mxu0 %v3281_v16  ;;  %1428 = vmatpush1.msra.mxu1 %v3284_v19  ;;  %3792 = vst [vmem:[#allocation23_spill] sm:$0xff] %v3293_v14  ;;  %3793 = vst [vmem:[#allocation24_spill] sm:$0xff] %v3297_v15  ;;  %v3794_v19 = vld [vmem:[#allocation42_spill] sm:$0xff] }
 0x445   :  { %1358 = vmatprep.subr.mxu0 %v3287_v20  ;;  %1429 = vmatprep.subr.mxu1 %v3290_v21 }
 0x446   :  { %1359 = vmatpush1.msra.mxu0 %v3293_v14  ;;  %1392 = vmatprep.mubr.f32.mxu0 %v3761_v30 }
 0x447   :  { %1430 = vmatpush1.msra.mxu1 %v3297_v15  ;;  %1463 = vmatprep.mubr.f32.mxu1 %v3761_v30 }
 0x448   :  { %1505 = vmatprep.subr.mxu0 %v3025_v32  ;;  %1576 = vmatprep.subr.mxu1 %v3028_v33 }
 0x4e7   :  { %v1217_v20 = vpop.f32.mrf.mxu0  ;;  %v1288_v14 = vpop.f32.mrf.mxu1 }
 0x4e8   :  { %v1293_v16 = vadd.f32 %v1217_v20, %v3794_v19  ;;  %v1295_v30 = vadd.f32 %v1288_v14, %v3797_v57  ;;  %v3803_v14 = vld [vmem:[#allocation13_spill] sm:$0xff] }
 0x4e9   :  { %v1219_v21 = vpop.f32.mrf.mxu0  ;;  %v1290_v27 = vpop.f32.mrf.mxu1 }
 0x4ea   :  { %v2082_v13 = vmul.f32 -1.442695, %v1293_v16  ;;  %v1294_v36 = vadd.f32 %v1219_v21, %v3795_v12  ;;  %v1296_v15 = vadd.f32 %v1290_v27, %v3796_v58  ;;  %v3802_v27 = vld [vmem:[#allocation31_spill] sm:$0xff] }
 0x4ec   :  { %2246 = vpow2.f32 %v2082_v13  ;;  %v2083_v6 = vmul.f32 -1.442695, %v1294_v36  ;;  %v2084_v56 = vmul.f32 -1.442695, %v1296_v15  ;;  %v3804_v15 = vld [vmem:[#allocation14_spill] sm:$0xff] }
 0x4ee   :  { %2248 = vpow2.f32 %v2083_v6 }
 0x4ef   :  { %2250 = vtanh.f32 %v1295_v30 }
 0x4f0   :  { %2252 = vpow2.f32 %v2084_v56  ;;  %v3801_v56 = vld [vmem:[#allocation33_spill] sm:$0xff] }
 0x4f9   :  { %v2247_v32 = vpop.eup %2246 }
 0x4fa   :  { %v1300_v55 = vadd.f32 1.0, %v2247_v32 }
 0x4fb   :  { %v2249_v33 = vpop.eup %2248 }
 0x4fc   :  { %2254 = vrcp.f32 %v1300_v55  ;;  %v1306_v19 = vadd.f32 1.0, %v2249_v33  ;;  %v2251_v16 = vpop.eup %2250  ;;  %v3798_v33 = vld [vmem:[#allocation9_spill] sm:$0xff]  ;;  %v3800_v55 = vld [vmem:[#allocation32_spill] sm:$0xff] }
 0x4fd   :  { %v2253_v12 = vpop.eup %2252 }
 0x4fe   :  { %2256 = vrcp.f32 %v1306_v19  ;;  %v1313_v6 = vadd.f32 1.0, %v2253_v12  ;;  %v3805_v19 = vld [vmem:[#allocation15_spill] sm:$0xff]  ;;  %v3807_v12 = vld [vmem:[#allocation17_spill] sm:$0xff] }
 0x500   :  { %2258 = vrcp.f32 %v1313_v6  ;;  %v3811_v6 = vld [vmem:[#allocation21_spill] sm:$0xff] }
 0x509   :  { %v2255_v13 = vpop.eup %2254 }
 0x50a   :  { %v1317_v20 = vmul.f32 %v2255_v13, %v2251_v16  ;;  %v3806_v16 = vld [vmem:[#allocation16_spill] sm:$0xff]  ;;  %v3808_v13 = vld [vmem:[#allocation18_spill] sm:$0xff] }
 0x50b   :  { %v2257_v36 = vpop.eup %2256 }
 0x50c   :  { %v1316_v21 = vmul.f32 %v2257_v36, %v3158_v17  ;;  %v3799_v17 = vld [vmem:[#allocation30_spill] sm:$0xff]  ;;  %v3810_v36 = vld [vmem:[#allocation20_spill] sm:$0xff] }
 0x50d   :  { %v2259_v32 = vpop.eup %2258 }
 0x50e   :  { %v3308_v58 = vadd.f32 %v1317_v20, %v1316_v21  ;;  %v3809_v20 = vld [vmem:[#allocation19_spill] sm:$0xff]  ;;  %v3812_v21 = vld [vmem:[#allocation22_spill] sm:$0xff] }
 0x510   :  { %2260 = vtanh.f32 %v3308_v58 }
 0x51d   :  { %v2261_v30 = vpop.eup %2260 }
 0x51e   :  { %v1320_v57 = vmul.f32 %v2261_v30, %v2259_v32  ;;  %v3813_v32 = vld [vmem:[#allocation23_spill] sm:$0xff]  ;;  %v3814_v30 = vmov 0.0  }
 0x520   :  { %1393 = vmatmul.mubr.f32.vlgmr.msra.gmra.mxu0 %v1320_v57  ;;  %1464 = vmatmul.mubr.f32.vlgmr.msra.gmra.mxu1 %v1320_v57  ;;  %v3815_v57 = vld [vmem:[#allocation24_spill] sm:$0xff] }
 0x521   :  { %1506 = vmatpush1.msra.mxu0 %v3039_v45  ;;  %1577 = vmatpush1.msra.mxu1 %v3042_v3 }
 0x522   :  { %1507 = vmatprep.subr.mxu0 %v3045_v2  ;;  %1578 = vmatprep.subr.mxu1 %v3048_v7 }
 0x523   :  { %1508 = vmatpush1.msra.mxu0 %v3051_v60  ;;  %1579 = vmatpush1.msra.mxu1 %v3054_v63 }
 0x524   :  { %1509 = vmatprep.subr.mxu0 %v3057_v1  ;;  %1580 = vmatprep.subr.mxu1 %v3060_v5 }
 0x525   :  { %1510 = vmatpush1.msra.mxu0 %v3063_v62  ;;  %1581 = vmatpush1.msra.mxu1 %v3066_v59 }
 0x526   :  { %1511 = vmatprep.subr.mxu0 %v3069_v4  ;;  %1582 = vmatprep.subr.mxu1 %v3072_v11 }
 0x527   :  { %1512 = vmatpush1.msra.mxu0 %v3075_v10  ;;  %1583 = vmatpush1.msra.mxu1 %v3078_v18 }
 0x528   :  { %1513 = vmatprep.subr.mxu0 %v3081_v8  ;;  %1584 = vmatprep.subr.mxu1 %v3084_v34 }
 0x529   :  { %1514 = vmatpush1.msra.mxu0 %v3775_v22  ;;  %1585 = vmatpush1.msra.mxu1 %v3776_v23 }
 0x52a   :  { %1515 = vmatprep.subr.mxu0 %v3093_v38  ;;  %1586 = vmatprep.subr.mxu1 %v3096_v54 }
 0x52b   :  { %1516 = vmatpush1.msra.mxu0 %v3099_v0  ;;  %1587 = vmatpush1.msra.mxu1 %v3102_v61 }
 0x52c   :  { %1517 = vmatprep.subr.mxu0 %v3105_v35  ;;  %1588 = vmatprep.subr.mxu1 %v3108_v37 }
 0x52d   :  { %1518 = vmatpush1.msra.mxu0 %v3185_v24  ;;  %1589 = vmatpush1.msra.mxu1 %v3188_v25 }
 0x52e   :  { %1519 = vmatprep.subr.mxu0 %v3191_v26  ;;  %1590 = vmatprep.subr.mxu1 %v3194_v28 }
 0x52f   :  { %1520 = vmatpush1.msra.mxu0 %v3197_v29  ;;  %1591 = vmatpush1.msra.mxu1 %v3200_v31 }
 0x530   :  { %1521 = vmatprep.subr.mxu0 %v3203_v9  ;;  %1592 = vmatprep.subr.mxu1 %v3206_v39 }
 0x531   :  { %1522 = vmatpush1.msra.mxu0 %v3209_v40  ;;  %1593 = vmatpush1.msra.mxu1 %v3212_v41 }
 0x532   :  { %1523 = vmatprep.subr.mxu0 %v3215_v42  ;;  %1594 = vmatprep.subr.mxu1 %v3218_v43 }
 0x533   :  { %1524 = vmatpush1.msra.mxu0 %v3221_v44  ;;  %1595 = vmatpush1.msra.mxu1 %v3224_v46 }
 0x534   :  { %1525 = vmatprep.subr.mxu0 %v3227_v47  ;;  %1596 = vmatprep.subr.mxu1 %v3230_v48 }
 0x535   :  { %1526 = vmatpush1.msra.mxu0 %v3233_v49  ;;  %1597 = vmatpush1.msra.mxu1 %v3236_v50 }
 0x536   :  { %1527 = vmatprep.subr.mxu0 %v3239_v51  ;;  %1598 = vmatprep.subr.mxu1 %v3242_v52 }
 0x537   :  { %1528 = vmatpush1.msra.mxu0 %v3245_v53  ;;  %1599 = vmatpush1.msra.mxu1 %v3798_v33 }
 0x538   :  { %1529 = vmatprep.subr.mxu0 %v3799_v17  ;;  %1600 = vmatprep.subr.mxu1 %v3800_v55  ;;  %v3821_v55 = vld [vmem:[#allocation47_spill] sm:$0xff] }
 0x539   :  { %1530 = vmatpush1.msra.mxu0 %v3801_v56  ;;  %1601 = vmatpush1.msra.mxu1 %v3802_v27  ;;  %v3820_v56 = vld [vmem:[#allocation49_spill] sm:$0xff] }
 0x53a   :  { %1531 = vmatprep.subr.mxu0 %v3803_v14  ;;  %1602 = vmatprep.subr.mxu1 %v3804_v15 }
 0x53b   :  { %1532 = vmatpush1.msra.mxu0 %v3805_v19  ;;  %1603 = vmatpush1.msra.mxu1 %v3806_v16  ;;  %v3816_v16 = vld [vmem:[#allocation10_spill] sm:$0xff] }
 0x53c   :  { %1533 = vmatprep.subr.mxu0 %v3807_v12  ;;  %1604 = vmatprep.subr.mxu1 %v3808_v13  ;;  %v3817_v12 = vld [vmem:[#allocation11_spill] sm:$0xff] }
 0x53d   :  { %1534 = vmatpush1.msra.mxu0 %v3809_v20  ;;  %1605 = vmatpush1.msra.mxu1 %v3810_v36  ;;  %v3818_v20 = vld [vmem:[#allocation46_spill] sm:$0xff] }
 0x53e   :  { %1535 = vmatprep.subr.mxu0 %v3811_v6  ;;  %1606 = vmatprep.subr.mxu1 %v3812_v21  ;;  %v3819_v6 = vld [vmem:[#allocation48_spill] sm:$0xff] }
 0x53f   :  { %1536 = vmatpush1.msra.mxu0 %v3813_v32  ;;  %1569 = vmatprep.mubr.f32.mxu0 %v3814_v30 }
 0x540   :  { %1607 = vmatpush1.msra.mxu1 %v3815_v57  ;;  %1640 = vmatprep.mubr.f32.mxu1 %v3814_v30 }
 0x541   :  { %1682 = vmatprep.subr.mxu0 %v3816_v16  ;;  %1753 = vmatprep.subr.mxu1 %v3817_v12 }
 0x5e0   :  { %v1394_v13 = vpop.f32.mrf.mxu0  ;;  %v1465_v21 = vpop.f32.mrf.mxu1 }
 0x5e1   :  { %v1470_v19 = vadd.f32 %v1394_v13, %v3818_v20  ;;  %v1472_v30 = vadd.f32 %v1465_v21, %v3821_v55 }
 0x5e2   :  { %v1396_v36 = vpop.f32.mrf.mxu0  ;;  %v1467_v27 = vpop.f32.mrf.mxu1 }
 0x5e3   :  { %v2085_v15 = vmul.f32 -1.442695, %v1470_v19  ;;  %v1471_v14 = vadd.f32 %v1396_v36, %v3819_v6  ;;  %v1473_v57 = vadd.f32 %v1467_v27, %v3820_v56 }
 0x5e5   :  { %2262 = vpow2.f32 %v2085_v15  ;;  %v2086_v32 = vmul.f32 -1.442695, %v1471_v14  ;;  %v2087_v17 = vmul.f32 -1.442695, %v1473_v57  ;;  %v1871_v57 = vld [vmem:[%s3573_s4 + $0x70] sm:$0xff] }
 0x5e7   :  { %2264 = vpow2.f32 %v2086_v32 }
 0x5e8   :  { %2266 = vtanh.f32 %v1472_v30  ;;  %v1872_v30 = vld [vmem:[%s3573_s4 + $0x78] sm:$0xff] }
 0x5e9   :  { %2268 = vpow2.f32 %v2087_v17 }
 0x5f2   :  { %v2263_v16 = vpop.eup %2262 }
 0x5f3   :  { %v1477_v33 = vadd.f32 1.0, %v2263_v16  ;;  %v1870_v16 = vld [vmem:[%s3573_s4 + $0x68] sm:$0xff] }
 0x5f4   :  { %v2265_v12 = vpop.eup %2264 }
 0x5f5   :  { %2270 = vrcp.f32 %v1477_v33  ;;  %v1483_v13 = vadd.f32 1.0, %v2265_v12  ;;  %v2267_v19 = vpop.eup %2266  ;;  %v1869_v12 = vld [vmem:[%s3573_s4 + $0x60] sm:$0xff] }
 0x5f6   :  { %v2269_v20 = vpop.eup %2268 }
 0x5f7   :  { %2272 = vrcp.f32 %v1483_v13  ;;  %v1490_v6 = vadd.f32 1.0, %v2269_v20  ;;  %v1868_v13 = vld [vmem:[%s3573_s4 + $0x58] sm:$0xff]  ;;  %v1866_v20 = vld [vmem:[%s3573_s4 + $0x48] sm:$0xff] }
 0x5f9   :  { %2274 = vrcp.f32 %v1490_v6  ;;  %v1862_v6 = vld [vmem:[%s3573_s4 + $0x28] sm:$0xff] }
 0x602   :  { %v2271_v15 = vpop.eup %2270 }
 0x603   :  { %v1494_v36 = vmul.f32 %v2271_v15, %v2267_v19  ;;  %v1867_v19 = vld [vmem:[%s3573_s4 + $0x50] sm:$0xff]  ;;  %v1865_v15 = vld [vmem:[%s3573_s4 + $0x40] sm:$0xff] }
 0x604   :  { %v2273_v14 = vpop.eup %2272 }
 0x605   :  { %v1493_v32 = vmul.f32 %v2273_v14, %v3308_v58  ;;  %v1863_v14 = vld [vmem:[%s3573_s4 + $0x30] sm:$0xff] }
 0x606   :  { %v2275_v55 = vpop.eup %2274 }
 0x607   :  { %v3382_v56 = vadd.f32 %v1494_v36, %v1493_v32  ;;  %v1864_v36 = vld [vmem:[%s3573_s4 + $0x38] sm:$0xff]  ;;  %v1861_v32 = vld [vmem:[%s3573_s4 + $0x20] sm:$0xff] }
 0x609   :  { %2276 = vtanh.f32 %v3382_v56 }
 0x616   :  { %v2277_v27 = vpop.eup %2276 }
 0x617   :  { %v1497_v21 = vmul.f32 %v2277_v27, %v2275_v55  ;;  %v1859_v55 = vld [vmem:[%s3573_s4 + $0x10] sm:$0xff]  ;;  %v1858_v27 = vld [vmem:[%s3573_s4 + $0x8] sm:$0xff] }
 0x619   :  { %1570 = vmatmul.mubr.f32.vlgmr.msra.gmra.mxu0 %v1497_v21  ;;  %1641 = vmatmul.mubr.f32.vlgmr.msra.gmra.mxu1 %v1497_v21  ;;  %v1857_v21 = vld [vmem:[%s3573_s4] sm:$0xff] }
 0x61a   :  { %1683 = vmatpush1.msra.mxu0 %v3039_v45  ;;  %1754 = vmatpush1.msra.mxu1 %v3042_v3  ;;  %v3822_v45 = vld [vmem:[#allocation9_spill] sm:$0xff]  ;;  %v3823_v3 = vld [vmem:[#allocation30_spill] sm:$0xff] }
 0x61b   :  { %1684 = vmatprep.subr.mxu0 %v3045_v2  ;;  %1755 = vmatprep.subr.mxu1 %v3048_v7  ;;  %v3824_v2 = vld [vmem:[#allocation32_spill] sm:$0xff]  ;;  %v3825_v7 = vld [vmem:[#allocation33_spill] sm:$0xff] }
 0x61c   :  { %1685 = vmatpush1.msra.mxu0 %v3051_v60  ;;  %1756 = vmatpush1.msra.mxu1 %v3054_v63  ;;  %v3826_v60 = vld [vmem:[#allocation31_spill] sm:$0xff]  ;;  %v3827_v63 = vld [vmem:[#allocation13_spill] sm:$0xff] }
 0x61d   :  { %1686 = vmatprep.subr.mxu0 %v3057_v1  ;;  %1757 = vmatprep.subr.mxu1 %v3060_v5  ;;  %v3828_v1 = vld [vmem:[#allocation14_spill] sm:$0xff]  ;;  %v3829_v5 = vld [vmem:[#allocation15_spill] sm:$0xff] }
 0x61e   :  { %1687 = vmatpush1.msra.mxu0 %v3063_v62  ;;  %1758 = vmatpush1.msra.mxu1 %v3066_v59  ;;  %v3830_v62 = vld [vmem:[#allocation16_spill] sm:$0xff]  ;;  %v3831_v59 = vld [vmem:[#allocation17_spill] sm:$0xff] }
 0x61f   :  { %1688 = vmatprep.subr.mxu0 %v3069_v4  ;;  %1759 = vmatprep.subr.mxu1 %v3072_v11  ;;  %v3832_v4 = vld [vmem:[#allocation18_spill] sm:$0xff]  ;;  %v3833_v11 = vld [vmem:[#allocation19_spill] sm:$0xff] }
 0x620   :  { %1689 = vmatpush1.msra.mxu0 %v3075_v10  ;;  %1760 = vmatpush1.msra.mxu1 %v3078_v18  ;;  %v3834_v10 = vld [vmem:[#allocation20_spill] sm:$0xff]  ;;  %v3835_v18 = vld [vmem:[#allocation21_spill] sm:$0xff] }
 0x621   :  { %1690 = vmatprep.subr.mxu0 %v3081_v8  ;;  %1761 = vmatprep.subr.mxu1 %v3084_v34  ;;  %v3836_v8 = vld [vmem:[#allocation22_spill] sm:$0xff]  ;;  %v3837_v34 = vld [vmem:[#allocation23_spill] sm:$0xff] }
 0x622   :  { %1691 = vmatpush1.msra.mxu0 %v3775_v22  ;;  %1762 = vmatpush1.msra.mxu1 %v3776_v23  ;;  %v3841_v23 = vld [vmem:[#allocation52_spill] sm:$0xff] }
 0x623   :  { %1692 = vmatprep.subr.mxu0 %v3093_v38  ;;  %1763 = vmatprep.subr.mxu1 %v3096_v54  ;;  %v3840_v54 = vld [vmem:[#allocation50_spill] sm:$0xff] }
 0x624   :  { %1693 = vmatpush1.msra.mxu0 %v3099_v0  ;;  %1764 = vmatpush1.msra.mxu1 %v3102_v61 }
 0x625   :  { %1694 = vmatprep.subr.mxu0 %v3105_v35  ;;  %1765 = vmatprep.subr.mxu1 %v3108_v37  ;;  %v3838_v35 = vmov 0.0   ;;  %v3839_v37 = vld [vmem:[#allocation24_spill] sm:$0xff] }
 0x626   :  { %1695 = vmatpush1.msra.mxu0 %v3185_v24  ;;  %1766 = vmatpush1.msra.mxu1 %v3188_v25 }
 0x627   :  { %1696 = vmatprep.subr.mxu0 %v3191_v26  ;;  %1767 = vmatprep.subr.mxu1 %v3194_v28 }
 0x628   :  { %1697 = vmatpush1.msra.mxu0 %v3197_v29  ;;  %1768 = vmatpush1.msra.mxu1 %v3200_v31  ;;  %v3842_v29 = vld [vmem:[#allocation53_spill] sm:$0xff] }
 0x629   :  { %1698 = vmatprep.subr.mxu0 %v3203_v9  ;;  %1769 = vmatprep.subr.mxu1 %v3206_v39  ;;  %v3843_v9 = vld [vmem:[#allocation51_spill] sm:$0xff] }
 0x62a   :  { %1699 = vmatpush1.msra.mxu0 %v3209_v40  ;;  %1770 = vmatpush1.msra.mxu1 %v3212_v41 }
 0x62b   :  { %1700 = vmatprep.subr.mxu0 %v3215_v42  ;;  %1771 = vmatprep.subr.mxu1 %v3218_v43 }
 0x62c   :  { %1701 = vmatpush1.msra.mxu0 %v3221_v44  ;;  %1772 = vmatpush1.msra.mxu1 %v3224_v46 }
 0x62d   :  { %1702 = vmatprep.subr.mxu0 %v3227_v47  ;;  %1773 = vmatprep.subr.mxu1 %v3230_v48 }
 0x62e   :  { %1703 = vmatpush1.msra.mxu0 %v3233_v49  ;;  %1774 = vmatpush1.msra.mxu1 %v3236_v50 }
 0x62f   :  { %1704 = vmatprep.subr.mxu0 %v3239_v51  ;;  %1775 = vmatprep.subr.mxu1 %v3242_v52 }
 0x630   :  { %1705 = vmatpush1.msra.mxu0 %v3245_v53  ;;  %1776 = vmatpush1.msra.mxu1 %v3822_v45  ;;  %v1958_v45 = vld [vmem:[%s3575_s6 + $0x38] sm:$0xff] }
 0x631   :  { %1706 = vmatprep.subr.mxu0 %v3823_v3  ;;  %1777 = vmatprep.subr.mxu1 %v3824_v2  ;;  %v1957_v3 = vld [vmem:[%s3575_s6 + $0x30] sm:$0xff]  ;;  %v1956_v2 = vld [vmem:[%s3575_s6 + $0x28] sm:$0xff] }
 0x632   :  { %1707 = vmatpush1.msra.mxu0 %v3825_v7  ;;  %1778 = vmatpush1.msra.mxu1 %v3826_v60  ;;  %v1955_v7 = vld [vmem:[%s3575_s6 + $0x20] sm:$0xff]  ;;  %v1954_v60 = vld [vmem:[%s3575_s6 + $0x18] sm:$0xff] }
 0x633   :  { %1708 = vmatprep.subr.mxu0 %v3827_v63  ;;  %1779 = vmatprep.subr.mxu1 %v3828_v1  ;;  %v3844_v1 = vld [vmem:[#allocation54_spill] sm:$0xff] }
 0x634   :  { %1709 = vmatpush1.msra.mxu0 %v3829_v5  ;;  %1780 = vmatpush1.msra.mxu1 %v3830_v62 }
 0x635   :  { %1710 = vmatprep.subr.mxu0 %v3831_v59  ;;  %1781 = vmatprep.subr.mxu1 %v3832_v4  ;;  %v3845_v4 = vld [vmem:[#allocation56_spill] sm:$0xff] }
 0x636   :  { %1711 = vmatpush1.msra.mxu0 %v3833_v11  ;;  %1782 = vmatpush1.msra.mxu1 %v3834_v10 }
 0x637   :  { %1712 = vmatprep.subr.mxu0 %v3835_v18  ;;  %1783 = vmatprep.subr.mxu1 %v3836_v8 }
 0x638   :  { %1713 = vmatpush1.msra.mxu0 %v3837_v34  ;;  %1746 = vmatprep.mubr.f32.mxu0 %v3838_v35  ;;  %v3846_v34 = vld [vmem:[#allocation57_spill] sm:$0xff] }
 0x639   :  { %1784 = vmatpush1.msra.mxu1 %v3839_v37  ;;  %1817 = vmatprep.mubr.f32.mxu1 %v3838_v35 }
 0x63a   :  { %2123 = vmatprep.subr.mxu0 %v3838_v35  ;;  %2158 = vmatprep.subr.mxu1 %v3838_v35 }
 0x6d9   :  { %v1571_v38 = vpop.f32.mrf.mxu0  ;;  %v1642_v25 = vpop.f32.mrf.mxu1 }
 0x6da   :  { %v1647_v0 = vadd.f32 %v1571_v38, %v3840_v54  ;;  %v1649_v39 = vadd.f32 %v1642_v25, %v3843_v9  ;;  %v3847_v38 = vld [vmem:[#allocation55_spill] sm:$0xff] }
 0x6db   :  { %v1573_v61 = vpop.f32.mrf.mxu0  ;;  %v1644_v28 = vpop.f32.mrf.mxu1 }
 0x6dc   :  { %v2088_v22 = vmul.f32 -1.442695, %v1647_v0  ;;  %v1648_v24 = vadd.f32 %v1573_v61, %v3841_v23  ;;  %v1650_v31 = vadd.f32 %v1644_v28, %v3842_v29 }
 0x6de   :  { %2278 = vpow2.f32 %v2088_v22  ;;  %v2089_v26 = vmul.f32 -1.442695, %v1648_v24  ;;  %v2090_v40 = vmul.f32 -1.442695, %v1650_v31 }
 0x6e0   :  { %2280 = vpow2.f32 %v2089_v26 }
 0x6e1   :  { %2282 = vtanh.f32 %v1649_v39 }
 0x6e2   :  { %2284 = vpow2.f32 %v2090_v40 }
 0x6eb   :  { %v2279_v41 = vpop.eup %2278 }
 0x6ec   :  { %v1654_v42 = vadd.f32 1.0, %v2279_v41 }
 0x6ed   :  { %v2281_v43 = vpop.eup %2280 }
 0x6ee   :  { %2286 = vrcp.f32 %v1654_v42  ;;  %v1660_v44 = vadd.f32 1.0, %v2281_v43  ;;  %v2283_v46 = vpop.eup %2282 }
 0x6ef   :  { %v2285_v47 = vpop.eup %2284 }
 0x6f0   :  { %2288 = vrcp.f32 %v1660_v44  ;;  %v1667_v51 = vadd.f32 1.0, %v2285_v47  ;;  %v1953_v44 = vld [vmem:[%s3575_s6 + $0x10] sm:$0xff]  ;;  %v1951_v47 = vld [vmem:[%s3575_s6] sm:$0xff] }
 0x6f2   :  { %2290 = vrcp.f32 %v1667_v51 }
 0x6fb   :  { %v2287_v48 = vpop.eup %2286 }
 0x6fc   :  { %v1671_v49 = vmul.f32 %v2287_v48, %v2283_v46  ;;  %v1952_v46 = vld [vmem:[%s3575_s6 + $0x8] sm:$0xff]  ;;  %v2094_v48 = vld [vmem:[%s3574_s5] ss:$0 sm:$0xff] }
 0x6fd   :  { %v2289_v50 = vpop.eup %2288 }
 0x6fe   :  { %v1670_v52 = vmul.f32 %v2289_v50, %v3382_v56  ;;  %v1860_v56 = vld [vmem:[%s3573_s4 + $0x18] sm:$0xff] }
 0x6ff   :  { %v2291_v58 = vpop.eup %2290 }
 0x700   :  { %v3456_v53 = vadd.f32 %v1671_v49, %v1670_v52 }
 0x702   :  { %2292 = vtanh.f32 %v3456_v53 }
 0x70f   :  { %v2293_v33 = vpop.eup %2292 }
 0x710   :  { %v1674_v17 = vmul.f32 %v2293_v33, %v2291_v58 }
 0x712   :  { %1747 = vmatmul.mubr.f32.vlgmr.msra.gmra.mxu0 %v1674_v17  ;;  %1818 = vmatmul.mubr.f32.vlgmr.msra.gmra.mxu1 %v1674_v17 }
 0x713   :  { %2124 = vmatpush3.msra.mxu0 %v1872_v30  ;;  %2155 = vmatprep.mubr.msk.f32.mxu0 %vm2400_vm1, %v3838_v35 }
 0x714   :  { %2125 = vmatprep.subr.mxu0 %v3838_v35  ;;  %2174 = vmatprep.mubr.msk.f32.mxu1 %vm2400_vm1, %v3838_v35 }
 0x715   :  { %2126 = vmatpush3.msra.mxu0 %v1871_v57  ;;  %2159 = vmatpush3.msra.mxu1 %v1958_v45 }
 0x716   :  { %2127 = vmatprep.subr.mxu0 %v3838_v35  ;;  %2160 = vmatprep.subr.mxu1 %v3838_v35 }
 0x717   :  { %2128 = vmatpush3.msra.mxu0 %v1870_v16  ;;  %2161 = vmatpush3.msra.mxu1 %v1957_v3 }
 0x718   :  { %2129 = vmatprep.subr.mxu0 %v3838_v35  ;;  %2162 = vmatprep.subr.mxu1 %v3838_v35 }
 0x719   :  { %2130 = vmatpush3.msra.mxu0 %v1869_v12  ;;  %2163 = vmatpush3.msra.mxu1 %v1956_v2 }
 0x71a   :  { %2131 = vmatprep.subr.mxu0 %v3838_v35  ;;  %2164 = vmatprep.subr.mxu1 %v3838_v35 }
 0x71b   :  { %2132 = vmatpush3.msra.mxu0 %v1868_v13  ;;  %2165 = vmatpush3.msra.mxu1 %v1955_v7 }
 0x71c   :  { %2133 = vmatprep.subr.mxu0 %v3838_v35  ;;  %2166 = vmatprep.subr.mxu1 %v3838_v35 }
 0x71d   :  { %2134 = vmatpush3.msra.mxu0 %v1867_v19  ;;  %2167 = vmatpush3.msra.mxu1 %v1954_v60 }
 0x71e   :  { %2135 = vmatprep.subr.mxu0 %v3838_v35  ;;  %2168 = vmatprep.subr.mxu1 %v3838_v35 }
 0x71f   :  { %2136 = vmatpush3.msra.mxu0 %v1866_v20  ;;  %2169 = vmatpush3.msra.mxu1 %v1953_v44 }
 0x720   :  { %2137 = vmatprep.subr.mxu0 %v3838_v35  ;;  %2170 = vmatprep.subr.mxu1 %v3838_v35 }
 0x721   :  { %2138 = vmatpush3.msra.mxu0 %v1865_v15  ;;  %2171 = vmatpush3.msra.mxu1 %v1952_v46 }
 0x722   :  { %2139 = vmatprep.subr.mxu0 %v3838_v35  ;;  %2172 = vmatprep.subr.mxu1 %v3838_v35 }
 0x723   :  { %2140 = vmatpush3.msra.mxu0 %v1864_v36  ;;  %2173 = vmatpush3.msra.mxu1 %v1951_v47 }
 0x724   :  { %2141 = vmatprep.subr.mxu0 %v3838_v35 }
 0x725   :  { %2142 = vmatpush3.msra.mxu0 %v1863_v14 }
 0x726   :  { %2143 = vmatprep.subr.mxu0 %v3838_v35 }
 0x727   :  { %2144 = vmatpush3.msra.mxu0 %v1862_v6 }
 0x728   :  { %2145 = vmatprep.subr.mxu0 %v3838_v35 }
 0x729   :  { %2146 = vmatpush3.msra.mxu0 %v1861_v32 }
 0x72a   :  { %2147 = vmatprep.subr.mxu0 %v3838_v35 }
 0x72b   :  { %2148 = vmatpush3.msra.mxu0 %v1860_v56 }
 0x72c   :  { %2149 = vmatprep.subr.mxu0 %v3838_v35 }
 0x72d   :  { %2150 = vmatpush3.msra.mxu0 %v1859_v55 }
 0x72e   :  { %2151 = vmatprep.subr.mxu0 %v3838_v35 }
 0x72f   :  { %2152 = vmatpush3.msra.mxu0 %v1858_v27 }
 0x730   :  { %2153 = vmatprep.subr.mxu0 %v3838_v35 }
 0x731   :  { %2154 = vmatpush3.msra.mxu0 %v1857_v21 }
 0x7d2   :  { %v1748_v63 = vpop.f32.mrf.mxu0  ;;  %v1819_v10 = vpop.f32.mrf.mxu1 }
 0x7d3   :  { %v1824_v5 = vadd.f32 %v1748_v63, %v3844_v1  ;;  %v1826_v54 = vadd.f32 %v1819_v10, %v3847_v38 }
 0x7d4   :  { %v1750_v62 = vpop.f32.mrf.mxu0  ;;  %v1821_v8 = vpop.f32.mrf.mxu1 }
 0x7d5   :  { %v2091_v59 = vmul.f32 -1.442695, %v1824_v5  ;;  %v1825_v11 = vadd.f32 %v1750_v62, %v3845_v4  ;;  %v1827_v37 = vadd.f32 %v1821_v8, %v3846_v34 }
 0x7d7   :  { %2294 = vpow2.f32 %v2091_v59  ;;  %v2092_v18 = vmul.f32 -1.442695, %v1825_v11  ;;  %v2093_v0 = vmul.f32 -1.442695, %v1827_v37 }
 0x7d9   :  { %2296 = vpow2.f32 %v2092_v18 }
 0x7da   :  { %2298 = vtanh.f32 %v1826_v54 }
 0x7db   :  { %2300 = vpow2.f32 %v2093_v0 }
 0x7e4   :  { %v2295_v61 = vpop.eup %2294 }
 0x7e5   :  { %v1831_v22 = vadd.f32 1.0, %v2295_v61 }
 0x7e6   :  { %v2297_v23 = vpop.eup %2296 }
 0x7e7   :  { %2302 = vrcp.f32 %v1831_v22  ;;  %v1837_v24 = vadd.f32 1.0, %v2297_v23  ;;  %v2299_v25 = vpop.eup %2298 }
 0x7e8   :  { %v2301_v26 = vpop.eup %2300 }
 0x7e9   :  { %2304 = vrcp.f32 %v1837_v24  ;;  %v1844_v9 = vadd.f32 1.0, %v2301_v26 }
 0x7eb   :  { %2306 = vrcp.f32 %v1844_v9 }
 0x7f4   :  { %v2303_v28 = vpop.eup %2302 }
 0x7f5   :  { %v1848_v29 = vmul.f32 %v2303_v28, %v2299_v25 }
 0x7f6   :  { %v2305_v31 = vpop.eup %2304 }
 0x7f7   :  { %v1847_v39 = vmul.f32 %v2305_v31, %v3456_v53  ;;  %v2095_v53 = vld [vmem:[%s3576_s7] ss:$0 sm:$0xff] }
 0x7f8   :  { %v2307_v41 = vpop.eup %2306 }
 0x7f9   :  { %v1849_v40 = vadd.f32 %v1848_v29, %v1847_v39 }
 0x7fb   :  { %2308 = vtanh.f32 %v1849_v40 }
 0x808   :  { %v2309_v42 = vpop.eup %2308 }
 0x809   :  { %v1851_v43 = vmul.f32 %v2309_v42, %v2307_v41 }
 0x80b   :  { %2156 = vmatmul.mubr.f32.vlgmr.msra.gmra.mxu0 %v1851_v43 }
 0x8cb   :  { %v1946_v49 = vpop.f32.mrf.mxu0 }
 0x8cc   :  { %v1947_v50 = vadd.f32 %v2094_v48, %v1946_v49 }
 0x8cd   :  { %v2157_v51 = vpop.f32.mrf.mxu0 }
 0x8ce   :  { %v1950_v52 = vmax.f32 %v1947_v50, 0.0 }
 0x8d0   :  { %2175 = vmatmul.mubr.msk.f32.vlgmr.msra.gmra.mxu1 %vm1966_vm2, %v1950_v52 }
 0x990   :  { %v2036_v58 = vpop.f32.mrf.mxu1 }
 0x991   :  { %v2037_v33 = vadd.f32 %v2095_v53, %v2036_v58 }
 0x992   :  { %v2176_v17 = vpop.f32.mrf.mxu1 }
 0x993   :  { %2041 = vst.msk [vmem:[%s3577_s8] sm:$0xff] %vm2040_vm3, %v2037_v33 }
 0x994   :  { %2046 = vsyncpa [#allocation6], 1 }

</bundles_post_ra>
